<compile_context>
chip_gen: v7x
topology: tpu7x:2x2x1
jax: 0.10.0
libtpu: 0.0.40
codegen_flags: <defaults>
</compile_context>

<pallas_src>
import jax
import jax.numpy as jnp
from jax.experimental import pallas as pl
from jax.experimental.pallas import tpu as pltpu

NUM_CAPS = 8
OUT_CH = 32
KSIZE = 9
STRIDE = 2
N_FUSED = NUM_CAPS * OUT_CH  # 256


def _round_up(x, m):
    return ((x + m - 1) // m) * m


def primary_capsule_kernel(p_ref, w_ref, b_ref, g_ref, gt_ref, o_ref):
    """One M-tile of rows (rows = flattened (batch, output position)).

    p_ref : [TM, K]       im2col patches (K = C*9*9, order (c, kh, kw))
    w_ref : [K, 256]      fused conv weights, column n = caps*32 + out_ch
    b_ref : [1, 256]      fused biases (same column ordering)
    g_ref : [256, 32]     capsule-group sum matrix: G[c*32+oc, oc] = 1
    gt_ref: [32, 256]     G transpose (broadcasts factor back over capsules)
    o_ref : [TM, 256]     squashed capsule outputs, lane-dense
    """
    # Single fused MXU matmul: all 8 capsule convolutions at once.
    s = jnp.dot(p_ref[...], w_ref[...], preferred_element_type=jnp.float32)
    s = s + b_ref[...]                                              # [TM, 256]

    # Squared norm over the 8 capsules for each (row, out_channel), expressed
    # as a grouped reduction via a tiny matmul (no cross-lane shuffles):
    #   sq[m, oc] = sum_c s[m, c*32 + oc]^2
    sq = jnp.dot(s * s, g_ref[...], preferred_element_type=jnp.float32)  # [TM, 32]

    # squash:  v = (sq / (1 + sq)) * s / sqrt(sq)  ==  s * sqrt(sq) / (1 + sq)
    factor = jnp.sqrt(sq) / (1.0 + sq)                               # [TM, 32]

    # Broadcast the factor back to the fused 256-wide layout and scale.
    o_ref[...] = s * jnp.dot(factor, gt_ref[...],
                             preferred_element_type=jnp.float32)


def primary_capsule(x, weights, biases, *, tm=256):
    """x: [B, C, H, W] (NCHW), weights: [NUM_CAPS, OUT_CH, C, 9, 9],
    biases: [NUM_CAPS, OUT_CH]. Returns u_squash: [B, OUT_CH*OH*OW, NUM_CAPS]."""
    B, C, H, W = x.shape
    OH = (H - KSIZE) // STRIDE + 1
    OW = (W - KSIZE) // STRIDE + 1
    P = OH * OW
    K = C * KSIZE * KSIZE
    M = B * P

    # --- glue: im2col via one XLA conv. Output feature order is
    # (channel, kh, kw), matching PyTorch's OIHW weight flattening.
    patches = jax.lax.conv_general_dilated_patches(
        x, filter_shape=(KSIZE, KSIZE), window_strides=(STRIDE, STRIDE),
        padding="VALID", dimension_numbers=("NCHW", "OIHW", "NCHW"))
    # [B, K, OH, OW] -> [B*P, K], row m = b*P + (oh*OW + ow)
    patches = patches.reshape(B, K, P).transpose(0, 2, 1).reshape(M, K)
    # TODO(synk): in-kernel patch extraction would avoid materializing the
    # [M, K] im2col matrix in HBM (7x read blow-up vs raw x).

    TM = min(tm, _round_up(M, 8))
    M_pad = _round_up(M, TM)
    if M_pad != M:
        patches = jnp.pad(patches, ((0, M_pad - M), (0, 0)))

    # --- glue: fused weight / bias layout (column n = caps*OUT_CH + out_ch).
    w_fused = weights.reshape(NUM_CAPS, OUT_CH, K).transpose(2, 0, 1)
    w_fused = w_fused.reshape(K, N_FUSED).astype(jnp.float32)
    b_fused = biases.reshape(1, N_FUSED).astype(jnp.float32)

    # --- capsule-group reduction matrix and its transpose (constants).
    g = jnp.tile(jnp.eye(OUT_CH, dtype=jnp.float32), (NUM_CAPS, 1))  # [256, 32]
    gt = g.T                                                         # [32, 256]

    grid = (M_pad // TM,)
    flops = 2 * M_pad * K * N_FUSED + 4 * M_pad * N_FUSED * OUT_CH
    bytes_accessed = 4 * (M_pad * K + K * N_FUSED + N_FUSED
                          + 2 * N_FUSED * OUT_CH + M_pad * N_FUSED)

    out = pl.pallas_call(
        primary_capsule_kernel,
        out_shape=jax.ShapeDtypeStruct((M_pad, N_FUSED), jnp.float32),
        grid=grid,
        in_specs=[
            pl.BlockSpec((TM, K), lambda m: (m, 0)),          # patches (tiled)
            pl.BlockSpec((K, N_FUSED), lambda m: (0, 0)),     # weights (resident)
            pl.BlockSpec((1, N_FUSED), lambda m: (0, 0)),     # bias    (resident)
            pl.BlockSpec((N_FUSED, OUT_CH), lambda m: (0, 0)),  # G     (resident)
            pl.BlockSpec((OUT_CH, N_FUSED), lambda m: (0, 0)),  # G^T   (resident)
        ],
        out_specs=pl.BlockSpec((TM, N_FUSED), lambda m: (m, 0)),
        compiler_params=pltpu.CompilerParams(
            dimension_semantics=("parallel",)),
        cost_estimate=pl.CostEstimate(
            flops=flops,
            transcendentals=M_pad * OUT_CH,
            bytes_accessed=bytes_accessed),
    )(patches, w_fused, b_fused, g, gt)

    # --- glue: pure layout. out[m, c*32+oc] -> u[b, oc*P + pos, c]
    out = out[:M].reshape(B, P, NUM_CAPS, OUT_CH)
    u = jnp.transpose(out, (0, 3, 1, 2)).reshape(B, OUT_CH * P, NUM_CAPS)
    return u


def primary_capsule_reference(x, weights, biases):
    """Pure-JAX reference matching the PyTorch forward exactly."""
    B = x.shape[0]
    us = []
    for c in range(NUM_CAPS):
        y = jax.lax.conv_general_dilated(
            x, weights[c], window_strides=(STRIDE, STRIDE), padding="VALID",
            dimension_numbers=("NCHW", "OIHW", "NCHW"))
        y = y + biases[c][None, :, None, None]
        us.append(y.reshape(B, -1, 1))
    u = jnp.concatenate(us, axis=-1)
    sqn = jnp.sum(u * u, axis=-1, keepdims=True)
    return (sqn / (1.0 + sqn)) * u / jnp.sqrt(sqn)


if __name__ == "__main__":
    # Small shapes consistent with the module: H=W=20 so the conv output is
    # 6x6 (the PyTorch view hardcodes 32*6*6); in_channels reduced to 16.
    B, C, H, W = 2, 16, 20, 20

    key = jax.random.PRNGKey(0)
    kx, kw, kb = jax.random.split(key, 3)
    x = jax.random.normal(kx, (B, C, H, W), dtype=jnp.float32)
    weights = 0.05 * jax.random.normal(
        kw, (NUM_CAPS, OUT_CH, C, KSIZE, KSIZE), dtype=jnp.float32)
    biases = 0.05 * jax.random.normal(kb, (NUM_CAPS, OUT_CH), dtype=jnp.float32)

    out = primary_capsule(x, weights, biases)
    out = jax.block_until_ready(out)

    ref = jax.block_until_ready(primary_capsule_reference(x, weights, biases))

    assert out.shape == (B, OUT_CH * 6 * 6, NUM_CAPS), out.shape
    assert jnp.allclose(out, ref, atol=1e-4, rtol=1e-4), (
        float(jnp.max(jnp.abs(out - ref))))

    print("KERNEL_OK")
</pallas_src>

<mosaic_0001>
module attributes {stable_mosaic.version = 11 : i64} {
  func.func @primary_capsule_kernel(%arg0: i32, %arg1: memref<72x1296xf32, #tpu.memory_space<vmem>>, %arg2: memref<1296x256xf32, #tpu.memory_space<vmem>>, %arg3: memref<1x256xf32, #tpu.memory_space<vmem>>, %arg4: memref<256x32xf32, #tpu.memory_space<vmem>>, %arg5: memref<32x256xf32, #tpu.memory_space<vmem>>, %arg6: memref<72x256xf32, #tpu.memory_space<vmem>>) attributes {dimension_semantics = [#tpu.dimension_semantics<parallel>], iteration_bounds = array<i64: 1>, scalar_prefetch = 0 : i64, scratch_operands = 0 : i64, tpu.core_type = #tpu.core_type<tc>, window_params = [{transform_indices = @transform_0, window_bounds = array<i64: 72, 1296>}, {pipeline_mode = #tpu.pipeline_mode<synchronous>, transform_indices = @transform_1, window_bounds = array<i64: 1296, 256>}, {pipeline_mode = #tpu.pipeline_mode<synchronous>, transform_indices = @transform_2, window_bounds = array<i64: 1, 256>}, {pipeline_mode = #tpu.pipeline_mode<synchronous>, transform_indices = @transform_3, window_bounds = array<i64: 256, 32>}, {pipeline_mode = #tpu.pipeline_mode<synchronous>, transform_indices = @transform_4, window_bounds = array<i64: 32, 256>}, {transform_indices = @transform_5, window_bounds = array<i64: 72, 256>}]} {
    %c0 = arith.constant 0 : index
    %c0_0 = arith.constant 0 : index
    %0 = vector.load %arg1[%c0, %c0_0] : memref<72x1296xf32, #tpu.memory_space<vmem>>, vector<72x1296xf32>
    %c0_1 = arith.constant 0 : index
    %c0_2 = arith.constant 0 : index
    %1 = vector.load %arg2[%c0_1, %c0_2] : memref<1296x256xf32, #tpu.memory_space<vmem>>, vector<1296x256xf32>
    %cst = arith.constant dense<0.000000e+00> : vector<72x256xf32>
    %2 = tpu.matmul %0, %1, %cst {dimension_numbers = #tpu.dot_dimension_numbers<[1], [0], [0], [1], [0, 0, 1, 1], [], []>} : vector<72x1296xf32>, vector<1296x256xf32>, vector<72x256xf32> -> vector<72x256xf32>
    %c0_3 = arith.constant 0 : index
    %c0_4 = arith.constant 0 : index
    %3 = vector.load %arg3[%c0_3, %c0_4] : memref<1x256xf32, #tpu.memory_space<vmem>>, vector<1x256xf32>
    %4 = vector.broadcast %3 : vector<1x256xf32> to vector<72x256xf32>
    %5 = arith.addf %2, %4 : vector<72x256xf32>
    %6 = arith.mulf %5, %5 : vector<72x256xf32>
    %c0_5 = arith.constant 0 : index
    %c0_6 = arith.constant 0 : index
    %7 = vector.load %arg4[%c0_5, %c0_6] : memref<256x32xf32, #tpu.memory_space<vmem>>, vector<256x32xf32>
    %cst_7 = arith.constant dense<0.000000e+00> : vector<72x32xf32>
    %8 = tpu.matmul %6, %7, %cst_7 {dimension_numbers = #tpu.dot_dimension_numbers<[1], [0], [0], [1], [0, 0, 1, 1], [], []>} : vector<72x256xf32>, vector<256x32xf32>, vector<72x32xf32> -> vector<72x32xf32>
    %9 = math.sqrt %8 : vector<72x32xf32>
    %cst_8 = arith.constant 1.000000e+00 : f32
    %10 = vector.broadcast %cst_8 : f32 to vector<72x32xf32>
    %11 = arith.addf %10, %8 : vector<72x32xf32>
    %12 = arith.divf %9, %11 : vector<72x32xf32>
    %c0_9 = arith.constant 0 : index
    %c0_10 = arith.constant 0 : index
    %13 = vector.load %arg5[%c0_9, %c0_10] : memref<32x256xf32, #tpu.memory_space<vmem>>, vector<32x256xf32>
    %cst_11 = arith.constant dense<0.000000e+00> : vector<72x256xf32>
    %14 = tpu.matmul %12, %13, %cst_11 {dimension_numbers = #tpu.dot_dimension_numbers<[1], [0], [0], [1], [0, 0, 1, 1], [], []>} : vector<72x32xf32>, vector<32x256xf32>, vector<72x256xf32> -> vector<72x256xf32>
    %15 = arith.mulf %5, %14 : vector<72x256xf32>
    %c0_12 = arith.constant 0 : index
    %c0_13 = arith.constant 0 : index
    %16 = vector.load %arg6[%c0_12, %c0_13] : memref<72x256xf32, #tpu.memory_space<vmem>>, vector<72x256xf32>
    tpu.vector_store %arg6[%c0_12, %c0_13], %15 {strides = array<i32>} : memref<72x256xf32, #tpu.memory_space<vmem>>, vector<72x256xf32>,
    return
  }
  func.func @transform_0(%arg0: i32) -> (i32, i32) {
    %c0_i32 = arith.constant 0 : i32
    %c0_i32_0 = arith.constant 0 : i32
    return %arg0, %c0_i32 : i32, i32
  }
  func.func @transform_1(%arg0: i32) -> (i32, i32) {
    %c0_i32 = arith.constant 0 : i32
    %c0_i32_0 = arith.constant 0 : i32
    %c0_i32_1 = arith.constant 0 : i32
    return %c0_i32, %c0_i32_0 : i32, i32
  }
  func.func @transform_2(%arg0: i32) -> (i32, i32) {
    %c0_i32 = arith.constant 0 : i32
    %c0_i32_0 = arith.constant 0 : i32
    %c0_i32_1 = arith.constant 0 : i32
    return %c0_i32, %c0_i32_0 : i32, i32
  }
  func.func @transform_3(%arg0: i32) -> (i32, i32) {
    %c0_i32 = arith.constant 0 : i32
    %c0_i32_0 = arith.constant 0 : i32
    %c0_i32_1 = arith.constant 0 : i32
    return %c0_i32, %c0_i32_0 : i32, i32
  }
  func.func @transform_4(%arg0: i32) -> (i32, i32) {
    %c0_i32 = arith.constant 0 : i32
    %c0_i32_0 = arith.constant 0 : i32
    %c0_i32_1 = arith.constant 0 : i32
    return %c0_i32, %c0_i32_0 : i32, i32
  }
  func.func @transform_5(%arg0: i32) -> (i32, i32) {
    %c0_i32 = arith.constant 0 : i32
    %c0_i32_0 = arith.constant 0 : i32
    return %arg0, %c0_i32 : i32, i32
  }
}

</mosaic_0001>

<bundles_post_ra>
// kernel: tpu_custom_call.1
= control target key start
LH: loop header
LB: loop body
LE: loop exit
PB: predicated region body
PF: predicated region fallthrough
CT: control target
= control target key end

     0   :  { %10 = vsyncpa [#allocation3], 0  ;;  %s2844_s0 = inlined_call_operand.hbm [shape: f32[72,1296], index: 0, kind: input, shape index: {}]   ;;  %s2845_s1 = inlined_call_operand.hbm [shape: f32[1296,256], index: 1, kind: input, shape index: {}]   ;;  %s2846_s2 = inlined_call_operand.hbm [shape: f32[1,256], index: 2, kind: input, shape index: {}]   ;;  %s2847_s3 = inlined_call_operand.vmem [shape: f32[256,32], index: 3, kind: input, shape index: {}]   ;;  %s2848_s4 = inlined_call_operand.hbm [shape: f32[32,256], index: 4, kind: input, shape index: {}]   ;;  %s2849_s5 = inlined_call_operand.hbm [shape: f32[72,256], index: 5, kind: output, shape index: {}]  }
   0x1   :  { %11 = vsyncpa [#allocation6], 0 }
   0x2   :  { %12 = vsyncpa [#allocation9], 0 }
   0x3   :  { %13 = vsyncpa [#allocation4], 0  ;;  %s2424_s18 = smov [#allocation5]   ;;  %s2306_s22 = scalar_lea.hbm %s2845_s1, 41472 }
   0x4   :  { %s31_s19 = sshll.u32 %s2424_s18, 4  ;;  %p2307_p0 = scmp.ne.s32.totalorder %s2845_s1, %s2306_s22  ;;  %s32_s19 = int_to_ptr.vmem [resolvable:$true] %s31_s19 }
   0x5   :  { %p2310_p1 = scmp.lt.u32.totalorder %s2306_s22, %s2845_s1 }
   0x7   :  { %p2312_p2 = pnand %p2310_p1, %p2307_p0 }
   0x9   :  { %2315 = shalt.err (!%p2312_p2)
}
   0xa   :  { %s2316_s27 = scalar_lea.vmem %s32_s19, 41472  ;;  %p2321_p4 = scmp.lt.s32.totalorder %s32_s19, %s32_s19 }
   0xb   :  { %p2317_p3 = scmp.ne.s32.totalorder %s32_s19, %s2316_s27  ;;  %p2322_p5 = scmp.lt.s32.totalorder %s2316_s27, %s2316_s27 }
   0xd   :  { %p2323_p6 = por %p2322_p5, %p2321_p4 }
   0xf   :  { %p2324_p7 = pnand %p2323_p6, %p2317_p3 }
  0x11   :  { %2327 = shalt.err (!%p2324_p7)
}
  0x12   :  { %s2425_s28 = smov 256   ;;  %s2426_s29 = smov 16  }
  0x13   :  { %37 = dma.hbm_to_vmem [thread:$0]  %s2845_s1, 41472, %s32_s19, [#allocation6], %s2425_s28, %s2425_s28, %s2426_s29  }
  0x14   :  { %s2427_s7 = smov [#allocation2]   ;;  %s2328_s11 = scalar_lea.hbm %s2844_s0, 12672 }
  0x15   :  { %s19_s8 = sshll.u32 %s2427_s7, 4  ;;  %p2329_p8 = scmp.ne.s32.totalorder %s2844_s0, %s2328_s11  ;;  %s20_s8 = int_to_ptr.vmem [resolvable:$true] %s19_s8 }
  0x16   :  { %p2332_p9 = scmp.lt.u32.totalorder %s2328_s11, %s2844_s0 }
  0x18   :  { %p2334_p10 = pnand %p2332_p9, %p2329_p8 }
  0x1a   :  { %2337 = shalt.err (!%p2334_p10)
}
  0x1b   :  { %s2338_s16 = scalar_lea.vmem %s20_s8, 12672  ;;  %p2343_p12 = scmp.lt.s32.totalorder %s20_s8, %s20_s8 }
  0x1c   :  { %p2339_p11 = scmp.ne.s32.totalorder %s20_s8, %s2338_s16  ;;  %p2344_p13 = scmp.lt.s32.totalorder %s2338_s16, %s2338_s16 }
  0x1e   :  { %p2345_p0 = por %p2344_p13, %p2343_p12 }
  0x20   :  { %p2346_p1 = pnand %p2345_p0, %p2339_p11 }
  0x22   :  { %2349 = shalt.err (!%p2346_p1)
}
  0x23   :  { %s2428_s1 = smov 1408   ;;  %s2429_s17 = smov 88  }
  0x24   :  { %25 = dma.hbm_to_vmem [thread:$0]  %s2844_s0, 12672, %s20_s8, [#allocation3], %s2428_s1, %s2428_s1, %s2429_s17  }
  0x25   :  { %s2430_s20 = smov [#allocation7]   ;;  %s2431_s22 = smov [#allocation8]  }
  0x26   :  { %s44_s21 = sshll.u32 %s2430_s20, 4  ;;  %s55_s23 = sshll.u32 %s2431_s22, 4  ;;  %s45_s21 = int_to_ptr.vmem [resolvable:$true] %s44_s21  ;;  %s2491_s23 = int_to_ptr.vmem [resolvable:$true] %s55_s23 }
  0x27   :  { %s2350_s26 = scalar_lea.hbm %s2846_s2, 32 }
  0x28   :  { %p2351_p2 = scmp.ne.s32.totalorder %s2846_s2, %s2350_s26  ;;  %p2354_p3 = scmp.lt.u32.totalorder %s2350_s26, %s2846_s2 }
  0x2a   :  { %p2356_p4 = pnand %p2354_p3, %p2351_p2 }
  0x2c   :  { %2359 = shalt.err (!%p2356_p4)
}
  0x2d   :  { %s2360_s0 = scalar_lea.vmem %s45_s21, 32  ;;  %p2365_p6 = scmp.lt.s32.totalorder %s45_s21, %s45_s21 }
  0x2e   :  { %p2361_p5 = scmp.ne.s32.totalorder %s45_s21, %s2360_s0  ;;  %p2366_p7 = scmp.lt.s32.totalorder %s2360_s0, %s2360_s0 }
  0x30   :  { %p2367_p8 = por %p2366_p7, %p2365_p6 }
  0x32   :  { %p2368_p9 = pnand %p2367_p8, %p2361_p5 }
  0x34   :  { %2371 = shalt.err (!%p2368_p9)
}
  0x35   :  { %47 = dma.hbm_to_vmem [thread:$0]  %s2846_s2, 32, %s45_s21, [#allocation6]  }
  0x36   :  { %s2372_s12 = scalar_lea.hbm %s2848_s4, 1024 }
  0x37   :  { %p2373_p10 = scmp.ne.s32.totalorder %s2848_s4, %s2372_s12  ;;  %p2376_p11 = scmp.lt.u32.totalorder %s2372_s12, %s2848_s4 }
  0x39   :  { %p2378_p12 = pnand %p2376_p11, %p2373_p10 }
  0x3b   :  { %2381 = shalt.err (!%p2378_p12)
}
  0x3c   :  { %s2382_s1 = scalar_lea.vmem %s2491_s23, 1024  ;;  %p2387_p0 = scmp.lt.s32.totalorder %s2491_s23, %s2491_s23 }
  0x3d   :  { %p2383_p13 = scmp.ne.s32.totalorder %s2491_s23, %s2382_s1  ;;  %p2388_p1 = scmp.lt.s32.totalorder %s2382_s1, %s2382_s1 }
  0x3f   :  { %p2389_p2 = por %p2388_p1, %p2387_p0 }
  0x41   :  { %p2390_p3 = pnand %p2389_p2, %p2383_p13 }
  0x43   :  { %2393 = shalt.err (!%p2390_p3)
}
  0x44   :  { %61 = dma.hbm_to_vmem [thread:$0]  %s2848_s4, 1024, %s2491_s23, [#allocation9], %s2425_s28, %s2425_s28, %s2426_s29  }
  0x45   :  { %2416 = dma.done.wait [#allocation3], 12672  }
  0x46   :  { %2417 = vsyncadd [#allocation3], 4294954624 }
  0x47   :  { %2418 = dma.done.wait [#allocation6], 41504  }
  0x48   :  { %2419 = vsyncadd [#allocation6], 4294925792 }
  0x49   :  { %2420 = dma.done.wait [#allocation9], 1024  }
  0x4a   :  { %2421 = vsyncadd [#allocation9], 4294966272  ;;  %v302_v0 = vld [vmem:[#allocation5 + $0x408] sm:$0xff]  ;;  %v304_v1 = vld [vmem:[#allocation5 + $0x418] sm:$0xff]  ;;  %vm509_vm0 = vcmask 130048   ;;  %vm1509_vm3 = vcmask 261120  }
  0x4b   :  { %v301_v2 = vld [vmem:[#allocation5 + $0x400] sm:$0xff]  ;;  %v1916_v3 = vpack.c.bf16 %v304_v1, %v302_v0  ;;  %v303_v4 = vld [vmem:[#allocation5 + $0x410] sm:$0xff]  ;;  %v306_v5 = vld [vmem:[#allocation5 + $0x428] sm:$0xff] }
  0x4c   :  { %v308_v6 = vld [vmem:[#allocation5 + $0x438] sm:$0xff]  ;;  %v1918_v7 = vpack.c.bf16 %v303_v4, %v301_v2  ;;  %v305_v9 = vld [vmem:[#allocation5 + $0x420] sm:$0xff]  ;;  %v307_v10 = vld [vmem:[#allocation5 + $0x430] sm:$0xff] }
  0x4d   :  { %v1920_v8 = vpack.c.bf16 %v308_v6, %v306_v5  ;;  %v310_v11 = vld [vmem:[#allocation5 + $0x448] sm:$0xff]  ;;  %1917 = vmatprep.subr.bf16.mxu0 %v1916_v3  ;;  %v312_v12 = vld [vmem:[#allocation5 + $0x458] sm:$0xff]  ;;  %v1922_v13 = vpack.c.bf16 %v307_v10, %v305_v9  ;;  %v309_v15 = vld [vmem:[#allocation5 + $0x440] sm:$0xff] }
  0x4e   :  { %1919 = vmatpush1.bf16.msra.mxu0 %v1918_v7  ;;  %v1924_v14 = vpack.c.bf16 %v312_v12, %v310_v11  ;;  %v311_v16 = vld [vmem:[#allocation5 + $0x450] sm:$0xff]  ;;  %v314_v17 = vld [vmem:[#allocation5 + $0x468] sm:$0xff]  ;;  %v316_v18 = vld [vmem:[#allocation5 + $0x478] sm:$0xff] }
  0x4f   :  { %1921 = vmatprep.subr.bf16.mxu0 %v1920_v8  ;;  %v1926_v19 = vpack.c.bf16 %v311_v16, %v309_v15  ;;  %v1928_v20 = vpack.c.bf16 %v316_v18, %v314_v17  ;;  %v313_v21 = vld [vmem:[#allocation5 + $0x460] sm:$0xff]  ;;  %v315_v22 = vld [vmem:[#allocation5 + $0x470] sm:$0xff]  ;;  %v318_v23 = vld [vmem:[#allocation5 + $0x488] sm:$0xff] }
  0x50   :  { %v320_v24 = vld [vmem:[#allocation5 + $0x498] sm:$0xff]  ;;  %v1930_v25 = vpack.c.bf16 %v315_v22, %v313_v21  ;;  %v174_v26 = vld [vmem:[#allocation5 + $0x8] sm:$0xff]  ;;  %v173_v28 = vld [vmem:[#allocation5] sm:$0xff] }
  0x51   :  { %v176_v27 = vld [vmem:[#allocation5 + $0x18] sm:$0xff]  ;;  %v1932_v29 = vpack.c.bf16 %v320_v24, %v318_v23  ;;  %v317_v30 = vld [vmem:[#allocation5 + $0x480] sm:$0xff]  ;;  %v319_v31 = vld [vmem:[#allocation5 + $0x490] sm:$0xff] }
  0x52   :  { %1923 = vmatpush1.bf16.msra.mxu0 %v1922_v13  ;;  %v1788_v32 = vpack.c.bf16 %v176_v27, %v174_v26  ;;  %v175_v33 = vld [vmem:[#allocation5 + $0x10] sm:$0xff]  ;;  %v322_v34 = vld [vmem:[#allocation5 + $0x4a8] sm:$0xff]  ;;  %v324_v35 = vld [vmem:[#allocation5 + $0x4b8] sm:$0xff]  ;;  %v1934_v41 = vpack.c.bf16 %v319_v31, %v317_v30 }
  0x53   :  { %1925 = vmatprep.subr.bf16.mxu0 %v1924_v14  ;;  %v1790_v36 = vpack.c.bf16 %v175_v33, %v173_v28  ;;  %v178_v37 = vld [vmem:[#allocation5 + $0x28] sm:$0xff]  ;;  %v180_v38 = vld [vmem:[#allocation5 + $0x38] sm:$0xff]  ;;  %v177_v39 = vld [vmem:[#allocation5 + $0x20] sm:$0xff]  ;;  %v1936_v46 = vpack.c.bf16 %v324_v35, %v322_v34 }
  0x54   :  { %1789 = vmatprep.subr.bf16.mxu1 %v1788_v32  ;;  %v179_v40 = vld [vmem:[#allocation5 + $0x30] sm:$0xff]  ;;  %v321_v42 = vld [vmem:[#allocation5 + $0x4a0] sm:$0xff]  ;;  %v1792_v44 = vpack.c.bf16 %v180_v38, %v178_v37  ;;  %v326_v47 = vld [vmem:[#allocation5 + $0x4c8] sm:$0xff] }
  0x55   :  { %v323_v43 = vld [vmem:[#allocation5 + $0x4b0] sm:$0xff]  ;;  %1791 = vmatpush1.bf16.msra.mxu1 %v1790_v36  ;;  %v1794_v45 = vpack.c.bf16 %v179_v40, %v177_v39  ;;  %v182_v48 = vld [vmem:[#allocation5 + $0x48] sm:$0xff]  ;;  %v184_v49 = vld [vmem:[#allocation5 + $0x58] sm:$0xff] }
  0x56   :  { %1927 = vmatpush1.bf16.msra.mxu0 %v1926_v19  ;;  %v328_v50 = vld [vmem:[#allocation5 + $0x4d8] sm:$0xff]  ;;  %1793 = vmatprep.subr.bf16.mxu1 %v1792_v44  ;;  %v1796_v51 = vpack.c.bf16 %v184_v49, %v182_v48  ;;  %v181_v52 = vld [vmem:[#allocation5 + $0x40] sm:$0xff]  ;;  %v183_v53 = vld [vmem:[#allocation5 + $0x50] sm:$0xff]  ;;  %v1938_v54 = vpack.c.bf16 %v323_v43, %v321_v42 }
  0x57   :  { %1929 = vmatprep.subr.bf16.mxu0 %v1928_v20  ;;  %v325_v55 = vld [vmem:[#allocation5 + $0x4c0] sm:$0xff]  ;;  %v1798_v56 = vpack.c.bf16 %v183_v53, %v181_v52  ;;  %v186_v57 = vld [vmem:[#allocation5 + $0x68] sm:$0xff]  ;;  %v188_v58 = vld [vmem:[#allocation5 + $0x78] sm:$0xff]  ;;  %v1940_v59 = vpack.c.bf16 %v328_v50, %v326_v47 }
  0x58   :  { %v327_v60 = vld [vmem:[#allocation5 + $0x4d0] sm:$0xff]  ;;  %v1800_v61 = vpack.c.bf16 %v188_v58, %v186_v57  ;;  %v185_v62 = vld [vmem:[#allocation5 + $0x60] sm:$0xff]  ;;  %v330_v0 = vld [vmem:[#allocation5 + $0x4e8] sm:$0xff] }
  0x59   :  { %1795 = vmatpush1.bf16.msra.mxu1 %v1794_v45  ;;  %v187_v63 = vld [vmem:[#allocation5 + $0x70] sm:$0xff]  ;;  %v332_v1 = vld [vmem:[#allocation5 + $0x4f8] sm:$0xff]  ;;  %v190_v2 = vld [vmem:[#allocation5 + $0x88] sm:$0xff]  ;;  %v1942_v4 = vpack.c.bf16 %v327_v60, %v325_v55 }
  0x5a   :  { %1931 = vmatpush1.bf16.msra.mxu0 %v1930_v25  ;;  %1797 = vmatprep.subr.bf16.mxu1 %v1796_v51  ;;  %v192_v3 = vld [vmem:[#allocation5 + $0x98] sm:$0xff]  ;;  %v329_v5 = vld [vmem:[#allocation5 + $0x4e0] sm:$0xff]  ;;  %v331_v6 = vld [vmem:[#allocation5 + $0x4f0] sm:$0xff]  ;;  %v1802_v7 = vpack.c.bf16 %v187_v63, %v185_v62  ;;  %v1944_v8 = vpack.c.bf16 %v332_v1, %v330_v0 }
  0x5b   :  { %1933 = vmatprep.subr.bf16.mxu0 %v1932_v29  ;;  %v334_v9 = vld [vmem:[#allocation5 + $0x508] sm:$0xff]  ;;  %v1804_v10 = vpack.c.bf16 %v192_v3, %v190_v2  ;;  %v189_v11 = vld [vmem:[#allocation5 + $0x80] sm:$0xff]  ;;  %v191_v12 = vld [vmem:[#allocation5 + $0x90] sm:$0xff]  ;;  %v1946_v16 = vpack.c.bf16 %v331_v6, %v329_v5 }
  0x5c   :  { %v336_v13 = vld [vmem:[#allocation5 + $0x518] sm:$0xff]  ;;  %v194_v14 = vld [vmem:[#allocation5 + $0xa8] sm:$0xff]  ;;  %v333_v17 = vld [vmem:[#allocation5 + $0x500] sm:$0xff]  ;;  %v1806_v19 = vpack.c.bf16 %v191_v12, %v189_v11 }
  0x5d   :  { %1799 = vmatpush1.bf16.msra.mxu1 %v1798_v56  ;;  %v196_v15 = vld [vmem:[#allocation5 + $0xb8] sm:$0xff]  ;;  %v335_v18 = vld [vmem:[#allocation5 + $0x510] sm:$0xff]  ;;  %v1948_v20 = vpack.c.bf16 %v336_v13, %v334_v9  ;;  %v338_v21 = vld [vmem:[#allocation5 + $0x528] sm:$0xff] }
  0x5e   :  { %1935 = vmatpush1.bf16.msra.mxu0 %v1934_v41  ;;  %1801 = vmatprep.subr.bf16.mxu1 %v1800_v61  ;;  %v1808_v22 = vpack.c.bf16 %v196_v15, %v194_v14  ;;  %v193_v23 = vld [vmem:[#allocation5 + $0xa0] sm:$0xff]  ;;  %v195_v24 = vld [vmem:[#allocation5 + $0xb0] sm:$0xff]  ;;  %v340_v25 = vld [vmem:[#allocation5 + $0x538] sm:$0xff]  ;;  %v1950_v28 = vpack.c.bf16 %v335_v18, %v333_v17 }
  0x5f   :  { %1937 = vmatprep.subr.bf16.mxu0 %v1936_v46  ;;  %v198_v26 = vld [vmem:[#allocation5 + $0xc8] sm:$0xff]  ;;  %v200_v27 = vld [vmem:[#allocation5 + $0xd8] sm:$0xff]  ;;  %v337_v29 = vld [vmem:[#allocation5 + $0x520] sm:$0xff]  ;;  %v1810_v31 = vpack.c.bf16 %v195_v24, %v193_v23  ;;  %v1952_v33 = vpack.c.bf16 %v340_v25, %v338_v21 }
  0x60   :  { %v339_v30 = vld [vmem:[#allocation5 + $0x530] sm:$0xff]  ;;  %v342_v34 = vld [vmem:[#allocation5 + $0x548] sm:$0xff]  ;;  %v1812_v35 = vpack.c.bf16 %v200_v27, %v198_v26  ;;  %v197_v36 = vld [vmem:[#allocation5 + $0xc0] sm:$0xff] }
  0x61   :  { %1803 = vmatpush1.bf16.msra.mxu1 %v1802_v7  ;;  %v79_v32 = vld [vmem:[#allocation2 + $0x28] sm:$0xff]  ;;  %v344_v38 = vld [vmem:[#allocation5 + $0x558] sm:$0xff]  ;;  %v202_v39 = vld [vmem:[#allocation5 + $0xe8] sm:$0xff]  ;;  %v1954_v41 = vpack.c.bf16 %v339_v30, %v337_v29 }
  0x62   :  { %1939 = vmatpush1.bf16.msra.mxu0 %v1938_v54  ;;  %1805 = vmatprep.subr.bf16.mxu1 %v1804_v10  ;;  %v199_v37 = vld [vmem:[#allocation5 + $0xd0] sm:$0xff]  ;;  %v204_v40 = vld [vmem:[#allocation5 + $0xf8] sm:$0xff]  ;;  %v341_v42 = vld [vmem:[#allocation5 + $0x540] sm:$0xff]  ;;  %v1956_v45 = vpack.c.bf16 %v344_v38, %v342_v34 }
  0x63   :  { %1941 = vmatprep.subr.bf16.mxu0 %v1940_v59  ;;  %839 = vmatprep.mubr.f32.mxu0 %v79_v32  ;;  %v343_v43 = vld [vmem:[#allocation5 + $0x550] sm:$0xff]  ;;  %v1814_v44 = vpack.c.bf16 %v199_v37, %v197_v36  ;;  %v346_v46 = vld [vmem:[#allocation5 + $0x568] sm:$0xff]  ;;  %v1816_v47 = vpack.c.bf16 %v204_v40, %v202_v39  ;;  %v201_v48 = vld [vmem:[#allocation5 + $0xe0] sm:$0xff] }
  0x64   :  { %v203_v49 = vld [vmem:[#allocation5 + $0xf0] sm:$0xff]  ;;  %v348_v50 = vld [vmem:[#allocation5 + $0x578] sm:$0xff]  ;;  %v206_v51 = vld [vmem:[#allocation5 + $0x108] sm:$0xff]  ;;  %v1958_v53 = vpack.c.bf16 %v343_v43, %v341_v42 }
  0x65   :  { %1807 = vmatpush1.bf16.msra.mxu1 %v1806_v19  ;;  %v208_v52 = vld [vmem:[#allocation5 + $0x118] sm:$0xff]  ;;  %v345_v54 = vld [vmem:[#allocation5 + $0x560] sm:$0xff]  ;;  %v347_v55 = vld [vmem:[#allocation5 + $0x570] sm:$0xff]  ;;  %v1818_v56 = vpack.c.bf16 %v203_v49, %v201_v48  ;;  %v1960_v57 = vpack.c.bf16 %v348_v50, %v346_v46 }
  0x66   :  { %1943 = vmatpush1.bf16.msra.mxu0 %v1942_v4  ;;  %1809 = vmatprep.subr.bf16.mxu1 %v1808_v22  ;;  %v350_v58 = vld [vmem:[#allocation5 + $0x588] sm:$0xff]  ;;  %v1820_v59 = vpack.c.bf16 %v208_v52, %v206_v51  ;;  %v205_v60 = vld [vmem:[#allocation5 + $0x100] sm:$0xff]  ;;  %v207_v61 = vld [vmem:[#allocation5 + $0x110] sm:$0xff]  ;;  %v1962_v1 = vpack.c.bf16 %v347_v55, %v345_v54 }
  0x67   :  { %1945 = vmatprep.subr.bf16.mxu0 %v1944_v8  ;;  %v352_v62 = vld [vmem:[#allocation5 + $0x598] sm:$0xff]  ;;  %v210_v63 = vld [vmem:[#allocation5 + $0x128] sm:$0xff]  ;;  %v349_v2 = vld [vmem:[#allocation5 + $0x580] sm:$0xff]  ;;  %v1822_v4 = vpack.c.bf16 %v207_v61, %v205_v60 }
  0x68   :  { %v212_v0 = vld [vmem:[#allocation5 + $0x138] sm:$0xff]  ;;  %v351_v3 = vld [vmem:[#allocation5 + $0x590] sm:$0xff]  ;;  %v1964_v5 = vpack.c.bf16 %v352_v62, %v350_v58  ;;  %v354_v6 = vld [vmem:[#allocation5 + $0x5a8] sm:$0xff] }
  0x69   :  { %1811 = vmatpush1.bf16.msra.mxu1 %v1810_v31  ;;  %v1824_v7 = vpack.c.bf16 %v212_v0, %v210_v63  ;;  %v209_v8 = vld [vmem:[#allocation5 + $0x120] sm:$0xff]  ;;  %v211_v9 = vld [vmem:[#allocation5 + $0x130] sm:$0xff]  ;;  %v356_v10 = vld [vmem:[#allocation5 + $0x5b8] sm:$0xff]  ;;  %v1966_v13 = vpack.c.bf16 %v351_v3, %v349_v2 }
  0x6a   :  { %1947 = vmatpush1.bf16.msra.mxu0 %v1946_v16  ;;  %1813 = vmatprep.subr.bf16.mxu1 %v1812_v35  ;;  %v214_v11 = vld [vmem:[#allocation5 + $0x148] sm:$0xff]  ;;  %v216_v12 = vld [vmem:[#allocation5 + $0x158] sm:$0xff]  ;;  %v353_v14 = vld [vmem:[#allocation5 + $0x5a0] sm:$0xff]  ;;  %v1826_v16 = vpack.c.bf16 %v211_v9, %v209_v8  ;;  %v1968_v17 = vpack.c.bf16 %v356_v10, %v354_v6 }
  0x6b   :  { %1949 = vmatprep.subr.bf16.mxu0 %v1948_v20  ;;  %v355_v15 = vld [vmem:[#allocation5 + $0x5b0] sm:$0xff]  ;;  %v358_v18 = vld [vmem:[#allocation5 + $0x5c8] sm:$0xff]  ;;  %v1828_v19 = vpack.c.bf16 %v216_v12, %v214_v11  ;;  %v213_v20 = vld [vmem:[#allocation5 + $0x140] sm:$0xff] }
  0x6c   :  { %v215_v21 = vld [vmem:[#allocation5 + $0x150] sm:$0xff]  ;;  %v360_v22 = vld [vmem:[#allocation5 + $0x5d8] sm:$0xff]  ;;  %v218_v23 = vld [vmem:[#allocation5 + $0x168] sm:$0xff]  ;;  %v1970_v25 = vpack.c.bf16 %v355_v15, %v353_v14 }
  0x6d   :  { %1815 = vmatpush1.bf16.msra.mxu1 %v1814_v44  ;;  %v220_v24 = vld [vmem:[#allocation5 + $0x178] sm:$0xff]  ;;  %v357_v26 = vld [vmem:[#allocation5 + $0x5c0] sm:$0xff]  ;;  %v359_v27 = vld [vmem:[#allocation5 + $0x5d0] sm:$0xff]  ;;  %v1972_v29 = vpack.c.bf16 %v360_v22, %v358_v18 }
  0x6e   :  { %1951 = vmatpush1.bf16.msra.mxu0 %v1950_v28  ;;  %1817 = vmatprep.subr.bf16.mxu1 %v1816_v47  ;;  %v1830_v28 = vpack.c.bf16 %v215_v21, %v213_v20  ;;  %v362_v30 = vld [vmem:[#allocation5 + $0x5e8] sm:$0xff]  ;;  %v1832_v31 = vpack.c.bf16 %v220_v24, %v218_v23  ;;  %v217_v32 = vld [vmem:[#allocation5 + $0x160] sm:$0xff]  ;;  %v364_v34 = vld [vmem:[#allocation5 + $0x5f8] sm:$0xff]  ;;  %v1974_v37 = vpack.c.bf16 %v359_v27, %v357_v26 }
  0x6f   :  { %1953 = vmatprep.subr.bf16.mxu0 %v1952_v33  ;;  %v219_v33 = vld [vmem:[#allocation5 + $0x170] sm:$0xff]  ;;  %v222_v35 = vld [vmem:[#allocation5 + $0x188] sm:$0xff]  ;;  %v224_v36 = vld [vmem:[#allocation5 + $0x198] sm:$0xff]  ;;  %v1976_v42 = vpack.c.bf16 %v364_v34, %v362_v30 }
  0x70   :  { %v361_v38 = vld [vmem:[#allocation5 + $0x5e0] sm:$0xff]  ;;  %v363_v39 = vld [vmem:[#allocation5 + $0x5f0] sm:$0xff]  ;;  %v1834_v40 = vpack.c.bf16 %v219_v33, %v217_v32  ;;  %v366_v43 = vld [vmem:[#allocation5 + $0x608] sm:$0xff]  ;;  %v1836_v44 = vpack.c.bf16 %v224_v36, %v222_v35 }
  0x71   :  { %1819 = vmatpush1.bf16.msra.mxu1 %v1818_v56  ;;  %v223_v46 = vld [vmem:[#allocation5 + $0x190] sm:$0xff]  ;;  %v368_v47 = vld [vmem:[#allocation5 + $0x618] sm:$0xff]  ;;  %v226_v48 = vld [vmem:[#allocation5 + $0x1a8] sm:$0xff]  ;;  %v1978_v50 = vpack.c.bf16 %v363_v39, %v361_v38 }
  0x72   :  { %1955 = vmatpush1.bf16.msra.mxu0 %v1954_v41  ;;  %1821 = vmatprep.subr.bf16.mxu1 %v1820_v59  ;;  %v75_v41 = vld [vmem:[#allocation2 + $0x8] sm:$0xff]  ;;  %v228_v49 = vld [vmem:[#allocation5 + $0x1b8] sm:$0xff]  ;;  %v365_v51 = vld [vmem:[#allocation5 + $0x600] sm:$0xff]  ;;  %v1980_v54 = vpack.c.bf16 %v368_v47, %v366_v43 }
  0x73   :  { %1957 = vmatprep.subr.bf16.mxu0 %v1956_v45  ;;  %v221_v45 = vld [vmem:[#allocation5 + $0x180] sm:$0xff]  ;;  %601 = vmatprep.mubr.f32.mxu1 %v75_v41  ;;  %v367_v52 = vld [vmem:[#allocation5 + $0x610] sm:$0xff]  ;;  %v370_v55 = vld [vmem:[#allocation5 + $0x628] sm:$0xff]  ;;  %v1840_v56 = vpack.c.bf16 %v228_v49, %v226_v48 }
  0x74   :  { %v227_v58 = vld [vmem:[#allocation5 + $0x1b0] sm:$0xff]  ;;  %v372_v59 = vld [vmem:[#allocation5 + $0x638] sm:$0xff]  ;;  %v230_v60 = vld [vmem:[#allocation5 + $0x1c8] sm:$0xff]  ;;  %v1982_v63 = vpack.c.bf16 %v367_v52, %v365_v51 }
  0x75   :  { %1823 = vmatpush1.bf16.msra.mxu1 %v1822_v4  ;;  %v232_v61 = vld [vmem:[#allocation5 + $0x1d8] sm:$0xff]  ;;  %v78_v62 = vld [vmem:[#allocation2 + $0x20] sm:$0xff]  ;;  %v369_v0 = vld [vmem:[#allocation5 + $0x620] sm:$0xff]  ;;  %v1984_v3 = vpack.c.bf16 %v372_v59, %v370_v55 }
  0x76   :  { %1959 = vmatpush1.bf16.msra.mxu0 %v1958_v53  ;;  %1825 = vmatprep.subr.bf16.mxu1 %v1824_v7  ;;  %v1838_v53 = vpack.c.bf16 %v223_v46, %v221_v45  ;;  %v374_v4 = vld [vmem:[#allocation5 + $0x648] sm:$0xff]  ;;  %v229_v6 = vld [vmem:[#allocation5 + $0x1c0] sm:$0xff]  ;;  %v231_v7 = vld [vmem:[#allocation5 + $0x1d0] sm:$0xff] }
  0x77   :  { %1961 = vmatprep.subr.bf16.mxu0 %v1960_v57  ;;  %v225_v57 = vld [vmem:[#allocation5 + $0x1a0] sm:$0xff]  ;;  %v376_v8 = vld [vmem:[#allocation5 + $0x658] sm:$0xff]  ;;  %v234_v9 = vld [vmem:[#allocation5 + $0x1e8] sm:$0xff]  ;;  %v1846_v15 = vpack.c.bf16 %v231_v7, %v229_v6 }
  0x78   :  { %v1842_v2 = vpack.c.bf16 %v227_v58, %v225_v57  ;;  %v236_v10 = vld [vmem:[#allocation5 + $0x1f8] sm:$0xff]  ;;  %v90_v11 = vld [vmem:[#allocation2 + $0x80] sm:$0xff]  ;;  %v375_v14 = vld [vmem:[#allocation5 + $0x650] sm:$0xff] }
  0x79   :  { %1827 = vmatpush1.bf16.msra.mxu1 %v1826_v16  ;;  %v89_v16 = vld [vmem:[#allocation2 + $0x78] sm:$0xff]  ;;  %v378_v18 = vld [vmem:[#allocation5 + $0x668] sm:$0xff]  ;;  %v235_v21 = vld [vmem:[#allocation5 + $0x1f0] sm:$0xff] }
  0x7a   :  { %1963 = vmatpush1.bf16.msra.mxu0 %v1962_v1  ;;  %1829 = vmatprep.subr.bf16.mxu1 %v1828_v19  ;;  %v371_v1 = vld [vmem:[#allocation5 + $0x630] sm:$0xff]  ;;  %v1848_v19 = vpack.c.bf16 %v236_v10, %v234_v9  ;;  %v233_v20 = vld [vmem:[#allocation5 + $0x1e0] sm:$0xff]  ;;  %v380_v22 = vld [vmem:[#allocation5 + $0x678] sm:$0xff] }
  0x7b   :  { %1965 = vmatprep.subr.bf16.mxu0 %v1964_v5  ;;  %v1844_v5 = vpack.c.bf16 %v232_v61, %v230_v60  ;;  %v1986_v12 = vpack.c.bf16 %v371_v1, %v369_v0  ;;  %v238_v23 = vld [vmem:[#allocation5 + $0x208] sm:$0xff]  ;;  %v240_v24 = vld [vmem:[#allocation5 + $0x218] sm:$0xff]  ;;  %v377_v27 = vld [vmem:[#allocation5 + $0x660] sm:$0xff] }
  0x7c   :  { %v100_v30 = vld [vmem:[#allocation2 + $0xd0] sm:$0xff]  ;;  %v382_v32 = vld [vmem:[#allocation5 + $0x688] sm:$0xff]  ;;  %v1852_v33 = vpack.c.bf16 %v240_v24, %v238_v23  ;;  %v237_v34 = vld [vmem:[#allocation5 + $0x200] sm:$0xff] }
  0x7d   :  { %1831 = vmatpush1.bf16.msra.mxu1 %v1830_v28  ;;  %v379_v28 = vld [vmem:[#allocation5 + $0x670] sm:$0xff]  ;;  %v384_v36 = vld [vmem:[#allocation5 + $0x698] sm:$0xff]  ;;  %v381_v39 = vld [vmem:[#allocation5 + $0x680] sm:$0xff] }
  0x7e   :  { %1967 = vmatpush1.bf16.msra.mxu0 %v1966_v13  ;;  %1833 = vmatprep.subr.bf16.mxu1 %v1832_v31  ;;  %v373_v13 = vld [vmem:[#allocation5 + $0x640] sm:$0xff]  ;;  %v1992_v31 = vpack.c.bf16 %v380_v22, %v378_v18  ;;  %v239_v35 = vld [vmem:[#allocation5 + $0x210] sm:$0xff]  ;;  %v244_v38 = vld [vmem:[#allocation5 + $0x238] sm:$0xff]  ;;  %v1994_v41 = vpack.c.bf16 %v379_v28, %v377_v27  ;;  %v1996_v46 = vpack.c.bf16 %v384_v36, %v382_v32 }
  0x7f   :  { %1969 = vmatprep.subr.bf16.mxu0 %v1968_v17  ;;  %v1988_v17 = vpack.c.bf16 %v376_v8, %v374_v4  ;;  %v1990_v26 = vpack.c.bf16 %v375_v14, %v373_v13  ;;  %v74_v43 = vld [vmem:[#allocation2] sm:$0xff]  ;;  %v111_v45 = vld [vmem:[#allocation2 + $0x128] sm:$0xff]  ;;  %v241_v49 = vld [vmem:[#allocation5 + $0x220] sm:$0xff] }
  0x80   :  { %v386_v47 = vld [vmem:[#allocation5 + $0x6a8] sm:$0xff]  ;;  %v388_v51 = vld [vmem:[#allocation5 + $0x6b8] sm:$0xff]  ;;  %v387_v57 = vld [vmem:[#allocation5 + $0x6b0] sm:$0xff] }
  0x81   :  { %1835 = vmatpush1.bf16.msra.mxu1 %v1834_v40  ;;  %v112_v40 = vld [vmem:[#allocation2 + $0x130] sm:$0xff]  ;;  %v246_v52 = vld [vmem:[#allocation5 + $0x248] sm:$0xff]  ;;  %v2000_v60 = vpack.c.bf16 %v388_v51, %v386_v47  ;;  %v247_v0 = vld [vmem:[#allocation5 + $0x250] sm:$0xff] }
  0x82   :  { %1971 = vmatpush1.bf16.msra.mxu0 %v1970_v25  ;;  %1837 = vmatprep.subr.bf16.mxu1 %v1836_v44  ;;  %v101_v25 = vld [vmem:[#allocation2 + $0xd8] sm:$0xff]  ;;  %v1854_v44 = vpack.c.bf16 %v239_v35, %v237_v34  ;;  %v122_v59 = vld [vmem:[#allocation2 + $0x180] sm:$0xff]  ;;  %v392_v1 = vld [vmem:[#allocation5 + $0x6d8] sm:$0xff] }
  0x83   :  { %1973 = vmatprep.subr.bf16.mxu0 %v1972_v29  ;;  %v1850_v29 = vpack.c.bf16 %v235_v21, %v233_v20  ;;  %v390_v61 = vld [vmem:[#allocation5 + $0x6c8] sm:$0xff]  ;;  %v389_v4 = vld [vmem:[#allocation5 + $0x6c0] sm:$0xff]  ;;  %v391_v8 = vld [vmem:[#allocation5 + $0x6d0] sm:$0xff] }
  0x84   :  { %v86_v6 = vld [vmem:[#allocation2 + $0x60] sm:$0xff]  ;;  %v133_v10 = vld [vmem:[#allocation2 + $0x1d8] sm:$0xff]  ;;  %v2006_v23 = vpack.c.bf16 %v391_v8, %v389_v4  ;;  %v395_v24 = vld [vmem:[#allocation5 + $0x6f0] sm:$0xff] }
  0x85   :  { %1839 = vmatpush1.bf16.msra.mxu1 %v1838_v53  ;;  %v248_v53 = vld [vmem:[#allocation5 + $0x258] sm:$0xff]  ;;  %v394_v13 = vld [vmem:[#allocation5 + $0x6e8] sm:$0xff]  ;;  %v393_v20 = vld [vmem:[#allocation5 + $0x6e0] sm:$0xff] }
  0x86   :  { %1975 = vmatpush1.bf16.msra.mxu0 %v1974_v37  ;;  %1841 = vmatprep.subr.bf16.mxu1 %v1840_v56  ;;  %v242_v37 = vld [vmem:[#allocation5 + $0x228] sm:$0xff]  ;;  %v385_v56 = vld [vmem:[#allocation5 + $0x6a0] sm:$0xff]  ;;  %v96_v27 = vld [vmem:[#allocation2 + $0xb0] sm:$0xff] }
  0x87   :  { %1977 = vmatprep.subr.bf16.mxu0 %v1976_v42  ;;  %v383_v42 = vld [vmem:[#allocation5 + $0x690] sm:$0xff]  ;;  %v1856_v48 = vpack.c.bf16 %v244_v38, %v242_v37  ;;  %v2002_v7 = vpack.c.bf16 %v387_v57, %v385_v56  ;;  %v254_v18 = vld [vmem:[#allocation5 + $0x288] sm:$0xff]  ;;  %v145_v21 = vld [vmem:[#allocation2 + $0x238] sm:$0xff] }
  0x88   :  { %v1998_v55 = vpack.c.bf16 %v383_v42, %v381_v39  ;;  %v97_v22 = vld [vmem:[#allocation2 + $0xb8] sm:$0xff]  ;;  %v255_v32 = vld [vmem:[#allocation5 + $0x290] sm:$0xff]  ;;  %v258_v34 = vld [vmem:[#allocation5 + $0x2a8] sm:$0xff]  ;;  %v2010_v39 = vpack.c.bf16 %v395_v24, %v393_v20 }
  0x89   :  { %1843 = vmatpush1.bf16.msra.mxu1 %v1842_v2  ;;  %v250_v2 = vld [vmem:[#allocation5 + $0x268] sm:$0xff]  ;;  %v260_v35 = vld [vmem:[#allocation5 + $0x2b8] sm:$0xff]  ;;  %v397_v36 = vld [vmem:[#allocation5 + $0x700] sm:$0xff] }
  0x8a   :  { %1979 = vmatpush1.bf16.msra.mxu0 %v1978_v50  ;;  %1845 = vmatprep.subr.bf16.mxu1 %v1844_v5  ;;  %v243_v50 = vld [vmem:[#allocation5 + $0x230] sm:$0xff]  ;;  %v134_v5 = vld [vmem:[#allocation2 + $0x1e0] sm:$0xff]  ;;  %v156_v37 = vld [vmem:[#allocation2 + $0x290] sm:$0xff] }
  0x8b   :  { %1981 = vmatprep.subr.bf16.mxu0 %v1980_v54  ;;  %v123_v54 = vld [vmem:[#allocation2 + $0x188] sm:$0xff]  ;;  %v1858_v58 = vpack.c.bf16 %v243_v50, %v241_v49  ;;  %v108_v38 = vld [vmem:[#allocation2 + $0x110] sm:$0xff]  ;;  %v257_v47 = vld [vmem:[#allocation5 + $0x2a0] sm:$0xff] }
  0x8c   :  { %v155_v42 = vld [vmem:[#allocation2 + $0x288] sm:$0xff]  ;;  %v404_v49 = vld [vmem:[#allocation5 + $0x738] sm:$0xff]  ;;  %v262_v50 = vld [vmem:[#allocation5 + $0x2c8] sm:$0xff] }
  0x8d   :  { %840 = vmatmul.mubr.f32.vlgmr.msra.gmra.mrb[0].mxu0 %v78_v62  ;;  %1847 = vmatpush1.bf16.msra.mxu1 %v1846_v15  ;;  %v1860_v62 = vpack.c.bf16 %v248_v53, %v246_v52  ;;  %v249_v15 = vld [vmem:[#allocation5 + $0x260] sm:$0xff]  ;;  %v264_v51 = vld [vmem:[#allocation5 + $0x2d8] sm:$0xff]  ;;  %v167_v53 = vld [vmem:[#allocation2 + $0x2e8] sm:$0xff] }
  0x8e   :  { %1983 = vmatpush1.bf16.msra.mxu0 %v1982_v63  ;;  %845 = vmatprep.mubr.f32.mxu0 %v90_v11  ;;  %v245_v63 = vld [vmem:[#allocation5 + $0x240] sm:$0xff]  ;;  %v403_v56 = vld [vmem:[#allocation5 + $0x730] sm:$0xff]  ;;  %v140_v24 = vld [vmem:[#allocation2 + $0x210] sm:$0xff] }
  0x8f   :  { %1985 = vmatprep.subr.bf16.mxu0 %v1984_v3  ;;  %1849 = vmatprep.subr.bf16.mxu1 %v1848_v19  ;;  %v252_v3 = vld [vmem:[#allocation5 + $0x278] sm:$0xff]  ;;  %v1862_v9 = vpack.c.bf16 %v247_v0, %v245_v63  ;;  %v85_v11 = vld [vmem:[#allocation2 + $0x58] sm:$0xff]  ;;  %v263_v0 = vld [vmem:[#allocation5 + $0x2d0] sm:$0xff] }
  0x90   :  { %v1864_v14 = vpack.c.bf16 %v252_v3, %v250_v2  ;;  %v256_v19 = vld [vmem:[#allocation5 + $0x298] sm:$0xff]  ;;  %v401_v52 = vld [vmem:[#allocation5 + $0x720] sm:$0xff]  ;;  %v266_v2 = vld [vmem:[#allocation5 + $0x2e8] sm:$0xff] }
  0x91   :  { %846 = vmatmul.mubr.f32.gmra.mrb[2].mxu0 %v89_v16  ;;  %1851 = vmatpush1.bf16.msra.mxu1 %v1850_v29  ;;  %v251_v16 = vld [vmem:[#allocation5 + $0x270] sm:$0xff]  ;;  %v398_v29 = vld [vmem:[#allocation5 + $0x708] sm:$0xff]  ;;  %v261_v63 = vld [vmem:[#allocation5 + $0x2c0] sm:$0xff] }
  0x92   :  { %1987 = vmatpush1.bf16.msra.mxu0 %v1986_v12  ;;  %851 = vmatprep.mubr.f32.mxu0 %v101_v25  ;;  %v2004_v12 = vpack.c.bf16 %v392_v1, %v390_v61  ;;  %v1866_v25 = vpack.c.bf16 %v251_v16, %v249_v15  ;;  %v406_v61 = vld [vmem:[#allocation5 + $0x748] sm:$0xff]  ;;  %v408_v1 = vld [vmem:[#allocation5 + $0x758] sm:$0xff]  ;;  %v81_v4 = vld [vmem:[#allocation2 + $0x38] sm:$0xff] }
  0x93   :  { %1989 = vmatprep.subr.bf16.mxu0 %v1988_v17  ;;  %1853 = vmatprep.subr.bf16.mxu1 %v1852_v33  ;;  %v396_v17 = vld [vmem:[#allocation5 + $0x6f8] sm:$0xff]  ;;  %v407_v8 = vld [vmem:[#allocation5 + $0x750] sm:$0xff] }
  0x94   :  { %602 = vmatmul.mubr.f32.vlgmr.msra.gmra.mrb[0].mxu1 %v74_v43  ;;  %v2008_v28 = vpack.c.bf16 %v396_v17, %v394_v13  ;;  %v400_v33 = vld [vmem:[#allocation5 + $0x718] sm:$0xff]  ;;  %v107_v43 = vld [vmem:[#allocation2 + $0x108] sm:$0xff]  ;;  %v270_v17 = vld [vmem:[#allocation5 + $0x308] sm:$0xff] }
  0x95   :  { %852 = vmatmul.mubr.f32.gmra.mrb[4].mxu0 %v100_v30  ;;  %1855 = vmatpush1.bf16.msra.mxu1 %v1854_v44  ;;  %v1868_v30 = vpack.c.bf16 %v256_v19, %v254_v18  ;;  %v2012_v44 = vpack.c.bf16 %v400_v33, %v398_v29  ;;  %v268_v3 = vld [vmem:[#allocation5 + $0x2f8] sm:$0xff]  ;;  %v267_v15 = vld [vmem:[#allocation5 + $0x2f0] sm:$0xff]  ;;  %v141_v19 = vld [vmem:[#allocation2 + $0x218] sm:$0xff] }
  0x96   :  { %1991 = vmatpush1.bf16.msra.mxu0 %v1990_v26  ;;  %857 = vmatprep.mubr.f32.mxu0 %v112_v40  ;;  %v144_v26 = vld [vmem:[#allocation2 + $0x230] sm:$0xff]  ;;  %v399_v40 = vld [vmem:[#allocation5 + $0x710] sm:$0xff]  ;;  %v1880_v13 = vpack.c.bf16 %v268_v3, %v266_v2  ;;  %v426_v3 = vld [vmem:[#allocation5 + $0x7e8] sm:$0xff] }
  0x97   :  { %1993 = vmatprep.subr.bf16.mxu0 %v1992_v31  ;;  %1857 = vmatprep.subr.bf16.mxu1 %v1856_v48  ;;  %v253_v31 = vld [vmem:[#allocation5 + $0x280] sm:$0xff]  ;;  %v259_v48 = vld [vmem:[#allocation5 + $0x2b0] sm:$0xff]  ;;  %v412_v16 = vld [vmem:[#allocation5 + $0x778] sm:$0xff] }
  0x98   :  { %607 = vmatprep.mubr.f32.mxu1 %v86_v6  ;;  %v1874_v57 = vpack.c.bf16 %v259_v48, %v257_v47  ;;  %v2018_v6 = vpack.c.bf16 %v403_v56, %v401_v52  ;;  %v272_v18 = vld [vmem:[#allocation5 + $0x318] sm:$0xff]  ;;  %v271_v29 = vld [vmem:[#allocation5 + $0x310] sm:$0xff]  ;;  %v162_v52 = vld [vmem:[#allocation2 + $0x2c0] sm:$0xff] }
  0x99   :  { %858 = vmatmul.mubr.f32.gmra.mrb[6].mxu0 %v111_v45  ;;  %1859 = vmatpush1.bf16.msra.mxu1 %v1858_v58  ;;  %v402_v45 = vld [vmem:[#allocation5 + $0x728] sm:$0xff]  ;;  %v152_v33 = vld [vmem:[#allocation2 + $0x270] sm:$0xff]  ;;  %v163_v47 = vld [vmem:[#allocation2 + $0x2c8] sm:$0xff] }
  0x9a   :  { %1995 = vmatpush1.bf16.msra.mxu0 %v1994_v41  ;;  %863 = vmatprep.mubr.f32.mxu0 %v123_v54  ;;  %v1870_v41 = vpack.c.bf16 %v255_v32, %v253_v31  ;;  %v119_v54 = vld [vmem:[#allocation2 + $0x168] sm:$0xff]  ;;  %v166_v58 = vld [vmem:[#allocation2 + $0x2e0] sm:$0xff]  ;;  %v276_v32 = vld [vmem:[#allocation5 + $0x338] sm:$0xff] }
  0x9b   :  { %1997 = vmatprep.subr.bf16.mxu0 %v1996_v46  ;;  %1861 = vmatprep.subr.bf16.mxu1 %v1860_v62  ;;  %v1872_v46 = vpack.c.bf16 %v260_v35, %v258_v34  ;;  %v1876_v62 = vpack.c.bf16 %v264_v51, %v262_v50  ;;  %v274_v31 = vld [vmem:[#allocation5 + $0x328] sm:$0xff]  ;;  %v413_v35 = vld [vmem:[#allocation5 + $0x780] sm:$0xff]  ;;  %v419_v50 = vld [vmem:[#allocation5 + $0x7b0] sm:$0xff] }
  0x9c   :  { %608 = vmatmul.mubr.f32.gmra.mrb[2].mxu1 %v85_v11  ;;  %v2020_v11 = vpack.c.bf16 %v408_v1, %v406_v61  ;;  %v277_v56 = vld [vmem:[#allocation5 + $0x340] sm:$0xff] }
  0x9d   :  { %864 = vmatmul.mubr.f32.gmra.mrb[8].mxu0 %v122_v59  ;;  %1863 = vmatpush1.bf16.msra.mxu1 %v1862_v9  ;;  %v118_v59 = vld [vmem:[#allocation2 + $0x160] sm:$0xff]  ;;  %v1878_v9 = vpack.c.bf16 %v263_v0, %v261_v63  ;;  %v77_v61 = vld [vmem:[#allocation2 + $0x18] sm:$0xff]  ;;  %v423_v0 = vld [vmem:[#allocation5 + $0x7d0] sm:$0xff] }
  0x9e   :  { %1999 = vmatpush1.bf16.msra.mxu0 %v1998_v55  ;;  %869 = vmatprep.mubr.f32.mxu0 %v134_v5  ;;  %v2014_v55 = vpack.c.bf16 %v399_v40, %v397_v36  ;;  %v130_v5 = vld [vmem:[#allocation2 + $0x1c0] sm:$0xff]  ;;  %v415_v36 = vld [vmem:[#allocation5 + $0x790] sm:$0xff]  ;;  %v421_v63 = vld [vmem:[#allocation5 + $0x7c0] sm:$0xff] }
  0x9f   :  { %2001 = vmatprep.subr.bf16.mxu0 %v2000_v60  ;;  %1865 = vmatprep.subr.bf16.mxu1 %v1864_v14  ;;  %v2016_v60 = vpack.c.bf16 %v404_v49, %v402_v45  ;;  %v265_v14 = vld [vmem:[#allocation5 + $0x2e0] sm:$0xff]  ;;  %v418_v40 = vld [vmem:[#allocation5 + $0x7a8] sm:$0xff]  ;;  %v2030_v48 = vpack.c.bf16 %v415_v36, %v413_v35 }
  0xa0   :  { %613 = vmatprep.mubr.f32.mxu1 %v97_v22  ;;  %v411_v22 = vld [vmem:[#allocation5 + $0x770] sm:$0xff]  ;;  %v278_v45 = vld [vmem:[#allocation5 + $0x348] sm:$0xff]  ;;  %v417_v49 = vld [vmem:[#allocation5 + $0x7a0] sm:$0xff] }
  0xa1   :  { %870 = vmatmul.mubr.f32.gmra.mrb[10].mxu0 %v133_v10  ;;  %614 = vmatmul.mubr.f32.gmra.mrb[4].mxu1 %v96_v27  ;;  %v129_v10 = vld [vmem:[#allocation2 + $0x1b8] sm:$0xff]  ;;  %v1884_v27 = vpack.c.bf16 %v272_v18, %v270_v17  ;;  %v287_v18 = vld [vmem:[#allocation5 + $0x390] sm:$0xff] }
  0xa2   :  { %2003 = vmatpush1.bf16.msra.mxu0 %v2002_v7  ;;  %875 = vmatprep.mubr.f32.mxu0 %v145_v21  ;;  %v405_v7 = vld [vmem:[#allocation5 + $0x740] sm:$0xff] }
  0xa3   :  { %2005 = vmatprep.subr.bf16.mxu0 %v2004_v12  ;;  %1867 = vmatpush1.bf16.msra.mxu1 %v1866_v25  ;;  %v410_v12 = vld [vmem:[#allocation5 + $0x768] sm:$0xff]  ;;  %v2022_v20 = vpack.c.bf16 %v407_v8, %v405_v7  ;;  %v409_v21 = vld [vmem:[#allocation5 + $0x760] sm:$0xff]  ;;  %v428_v7 = vld [vmem:[#allocation5 + $0x7f8] sm:$0xff] }
  0xa4   :  { %1869 = vmatprep.subr.bf16.mxu1 %v1868_v30  ;;  %619 = vmatprep.mubr.f32.mxu1 %v108_v38  ;;  %v2024_v25 = vpack.c.bf16 %v412_v16, %v410_v12  ;;  %v416_v30 = vld [vmem:[#allocation5 + $0x798] sm:$0xff]  ;;  %v2026_v34 = vpack.c.bf16 %v411_v22, %v409_v21  ;;  %v151_v38 = vld [vmem:[#allocation2 + $0x268] sm:$0xff]  ;;  %v286_v8 = vld [vmem:[#allocation5 + $0x388] sm:$0xff] }
  0xa5   :  { %876 = vmatmul.mubr.f32.gmra.mrb[12].mxu0 %v144_v26  ;;  %620 = vmatmul.mubr.f32.gmra.mrb[6].mxu1 %v107_v43  ;;  %v414_v26 = vld [vmem:[#allocation5 + $0x788] sm:$0xff]  ;;  %v275_v43 = vld [vmem:[#allocation5 + $0x330] sm:$0xff]  ;;  %v285_v17 = vld [vmem:[#allocation5 + $0x380] sm:$0xff] }
  0xa6   :  { %2007 = vmatpush1.bf16.msra.mxu0 %v2006_v23  ;;  %881 = vmatprep.mubr.f32.mxu0 %v156_v37  ;;  %v1882_v23 = vpack.c.bf16 %v267_v15, %v265_v14  ;;  %v427_v12 = vld [vmem:[#allocation5 + $0x7f0] sm:$0xff]  ;;  %v2040_v14 = vpack.c.bf16 %v428_v7, %v426_v3  ;;  %v430_v15 = vld [vmem:[#allocation5 + $0x808] sm:$0xff]  ;;  %v292_v21 = vld [vmem:[#allocation5 + $0x3b8] sm:$0xff] }
  0xa7   :  { %2009 = vmatprep.subr.bf16.mxu0 %v2008_v28  ;;  %1871 = vmatpush1.bf16.msra.mxu1 %v1870_v41  ;;  %v269_v28 = vld [vmem:[#allocation5 + $0x300] sm:$0xff]  ;;  %v1888_v41 = vpack.c.bf16 %v276_v32, %v274_v31  ;;  %v436_v31 = vld [vmem:[#allocation5 + $0x838] sm:$0xff]  ;;  %v294_v32 = vld [vmem:[#allocation5 + $0x3c8] sm:$0xff] }
  0xa8   :  { %1873 = vmatprep.subr.bf16.mxu1 %v1872_v46  ;;  %625 = vmatprep.mubr.f32.mxu1 %v119_v54  ;;  %v1886_v37 = vpack.c.bf16 %v271_v29, %v269_v28  ;;  %v280_v46 = vld [vmem:[#allocation5 + $0x358] sm:$0xff]  ;;  %v422_v54 = vld [vmem:[#allocation5 + $0x7c8] sm:$0xff]  ;;  %v289_v29 = vld [vmem:[#allocation5 + $0x3a0] sm:$0xff] }
  0xa9   :  { %882 = vmatmul.mubr.f32.gmra.mrb[14].mxu0 %v155_v42  ;;  %626 = vmatmul.mubr.f32.gmra.mrb[8].mxu1 %v118_v59  ;;  %v273_v42 = vld [vmem:[#allocation5 + $0x320] sm:$0xff]  ;;  %v282_v59 = vld [vmem:[#allocation5 + $0x368] sm:$0xff]  ;;  %v448_v3 = vld [vmem:[#allocation5 + $0x898] sm:$0xff] }
  0xaa   :  { %2011 = vmatpush1.bf16.msra.mxu0 %v2010_v39  ;;  %887 = vmatprep.mubr.f32.mxu0 %v167_v53  ;;  %v2028_v39 = vpack.c.bf16 %v416_v30, %v414_v26  ;;  %v1890_v51 = vpack.c.bf16 %v275_v43, %v273_v42  ;;  %v291_v30 = vld [vmem:[#allocation5 + $0x3b0] sm:$0xff]  ;;  %v433_v36 = vld [vmem:[#allocation5 + $0x820] sm:$0xff] }
  0xab   :  { %2013 = vmatprep.subr.bf16.mxu0 %v2012_v44  ;;  %1875 = vmatpush1.bf16.msra.mxu1 %v1874_v57  ;;  %v420_v44 = vld [vmem:[#allocation5 + $0x7b8] sm:$0xff]  ;;  %v279_v57 = vld [vmem:[#allocation5 + $0x350] sm:$0xff]  ;;  %v293_v42 = vld [vmem:[#allocation5 + $0x3c0] sm:$0xff] }
  0xac   :  { %1877 = vmatprep.subr.bf16.mxu1 %v1876_v62  ;;  %631 = vmatprep.mubr.f32.mxu1 %v130_v5  ;;  %v2032_v53 = vpack.c.bf16 %v420_v44, %v418_v40  ;;  %v2034_v62 = vpack.c.bf16 %v419_v50, %v417_v49  ;;  %v1894_v1 = vpack.c.bf16 %v279_v57, %v277_v56  ;;  %v281_v5 = vld [vmem:[#allocation5 + $0x360] sm:$0xff]  ;;  %v438_v40 = vld [vmem:[#allocation5 + $0x848] sm:$0xff]  ;;  %v295_v43 = vld [vmem:[#allocation5 + $0x3d0] sm:$0xff] }
  0xad   :  { %888 = vmatmul.mubr.f32.gmra.mrb[16].mxu0 %v166_v58  ;;  %632 = vmatmul.mubr.f32.gmra.mrb[10].mxu1 %v129_v10  ;;  %v424_v58 = vld [vmem:[#allocation5 + $0x7d8] sm:$0xff]  ;;  %v2038_v10 = vpack.c.bf16 %v423_v0, %v421_v63  ;;  %v437_v49 = vld [vmem:[#allocation5 + $0x840] sm:$0xff]  ;;  %v1910_v50 = vpack.c.bf16 %v295_v43, %v293_v42  ;;  %v299_v56 = vld [vmem:[#allocation5 + $0x3f0] sm:$0xff] }
  0xae   :  { %2015 = vmatpush1.bf16.msra.mxu0 %v2014_v55  ;;  %958 = vmatprep.mubr.f32.mxu0 %v81_v4  ;;  %v1892_v55 = vpack.c.bf16 %v280_v46, %v278_v45  ;;  %v2036_v2 = vpack.c.bf16 %v424_v58, %v422_v54  ;;  %v440_v44 = vld [vmem:[#allocation5 + $0x858] sm:$0xff]  ;;  %v298_v45 = vld [vmem:[#allocation5 + $0x3e8] sm:$0xff]  ;;  %v441_v0 = vld [vmem:[#allocation5 + $0x860] sm:$0xff] }
  0xaf   :  { %2017 = vmatprep.subr.bf16.mxu0 %v2016_v60  ;;  %1879 = vmatpush1.bf16.msra.mxu1 %v1878_v9  ;;  %v284_v60 = vld [vmem:[#allocation5 + $0x378] sm:$0xff]  ;;  %v442_v57 = vld [vmem:[#allocation5 + $0x868] sm:$0xff]  ;;  %v113_v7 = vld [vmem:[#allocation2 + $0x138] sm:$0xff] }
  0xb0   :  { %1881 = vmatprep.subr.bf16.mxu1 %v1880_v13  ;;  %637 = vmatprep.mubr.f32.mxu1 %v141_v19  ;;  %v1896_v4 = vpack.c.bf16 %v284_v60, %v282_v59  ;;  %v288_v9 = vld [vmem:[#allocation5 + $0x398] sm:$0xff]  ;;  %v103_v59 = vld [vmem:[#allocation2 + $0xe8] sm:$0xff]  ;;  %v462_v42 = vld [vmem:[#allocation5 + $0x908] sm:$0xff] }
  0xb1   :  { %638 = vmatmul.mubr.f32.gmra.mrb[12].mxu1 %v140_v24  ;;  %v1900_v16 = vpack.c.bf16 %v288_v9, %v286_v8  ;;  %v432_v19 = vld [vmem:[#allocation5 + $0x818] sm:$0xff]  ;;  %v431_v24 = vld [vmem:[#allocation5 + $0x810] sm:$0xff]  ;;  %v445_v9 = vld [vmem:[#allocation5 + $0x880] sm:$0xff] }
  0xb2   :  { %2019 = vmatpush1.bf16.msra.mxu0 %v2018_v6  ;;  %643 = vmatprep.mubr.f32.mxu1 %v152_v33  ;;  %v283_v6 = vld [vmem:[#allocation5 + $0x370] sm:$0xff]  ;;  %v2044_v26 = vpack.c.bf16 %v432_v19, %v430_v15  ;;  %v296_v33 = vld [vmem:[#allocation5 + $0x3d8] sm:$0xff]  ;;  %v449_v19 = vld [vmem:[#allocation5 + $0x8a0] sm:$0xff] }
  0xb3   :  { %2021 = vmatprep.subr.bf16.mxu0 %v2020_v11  ;;  %1883 = vmatpush1.bf16.msra.mxu1 %v1882_v23  ;;  %v425_v11 = vld [vmem:[#allocation5 + $0x7e0] sm:$0xff]  ;;  %v1898_v13 = vpack.c.bf16 %v283_v6, %v281_v5  ;;  %v300_v46 = vld [vmem:[#allocation5 + $0x3f8] sm:$0xff] }
  0xb4   :  { %1885 = vmatprep.subr.bf16.mxu1 %v1884_v27  ;;  %v2042_v22 = vpack.c.bf16 %v427_v12, %v425_v11  ;;  %v429_v23 = vld [vmem:[#allocation5 + $0x800] sm:$0xff]  ;;  %v434_v27 = vld [vmem:[#allocation5 + $0x828] sm:$0xff]  ;;  %v1912_v54 = vpack.c.bf16 %v300_v46, %v298_v45  ;;  %v444_v58 = vld [vmem:[#allocation5 + $0x878] sm:$0xff] }
  0xb5   :  { %644 = vmatmul.mubr.f32.gmra.mrb[14].mxu1 %v151_v38  ;;  %v2046_v35 = vpack.c.bf16 %v431_v24, %v429_v23  ;;  %v1906_v38 = vpack.c.bf16 %v291_v30, %v289_v29  ;;  %v2056_v63 = vpack.c.bf16 %v444_v58, %v442_v57  ;;  %v76_v6 = vld [vmem:[#allocation2 + $0x10] sm:$0xff]  ;;  %v125_v11 = vld [vmem:[#allocation2 + $0x198] sm:$0xff]  ;;  %v450_v12 = vld [vmem:[#allocation5 + $0x8a8] sm:$0xff] }
  0xb6   :  { %2023 = vmatpush1.bf16.msra.mxu0 %v2022_v20  ;;  %649 = vmatprep.mubr.f32.mxu1 %v163_v47  ;;  %v290_v20 = vld [vmem:[#allocation5 + $0x3a8] sm:$0xff]  ;;  %v92_v47 = vld [vmem:[#allocation2 + $0x90] sm:$0xff]  ;;  %v99_v24 = vld [vmem:[#allocation2 + $0xc8] sm:$0xff] }
  0xb7   :  { %2025 = vmatprep.subr.bf16.mxu0 %v2024_v25  ;;  %1887 = vmatpush1.bf16.msra.mxu1 %v1886_v37  ;;  %v1902_v25 = vpack.c.bf16 %v287_v18, %v285_v17  ;;  %v1904_v28 = vpack.c.bf16 %v292_v21, %v290_v20  ;;  %v435_v37 = vld [vmem:[#allocation5 + $0x830] sm:$0xff]  ;;  %v136_v21 = vld [vmem:[#allocation2 + $0x1f0] sm:$0xff]  ;;  %v453_v29 = vld [vmem:[#allocation5 + $0x8c0] sm:$0xff] }
  0xb8   :  { %1889 = vmatprep.subr.bf16.mxu1 %v1888_v41  ;;  %v1908_v41 = vpack.c.bf16 %v296_v33, %v294_v32  ;;  %v87_v17 = vld [vmem:[#allocation2 + $0x68] sm:$0xff]  ;;  %v456_v23 = vld [vmem:[#allocation5 + $0x8d8] sm:$0xff]  ;;  %v458_v32 = vld [vmem:[#allocation5 + $0x8e8] sm:$0xff] }
  0xb9   :  { %650 = vmatmul.mubr.f32.gmra.mrb[16].mxu1 %v162_v52  ;;  %v2052_v52 = vpack.c.bf16 %v440_v44, %v438_v40  ;;  %v451_v20 = vld [vmem:[#allocation5 + $0x8b0] sm:$0xff]  ;;  %v460_v33 = vld [vmem:[#allocation5 + $0x8f8] sm:$0xff]  ;;  %v121_v44 = vld [vmem:[#allocation2 + $0x178] sm:$0xff] }
  0xba   :  { %2027 = vmatpush1.bf16.msra.mxu0 %v2026_v34  ;;  %720 = vmatprep.mubr.f32.mxu1 %v77_v61  ;;  %v80_v34 = vld [vmem:[#allocation2 + $0x30] sm:$0xff]  ;;  %v455_v30 = vld [vmem:[#allocation5 + $0x8d0] sm:$0xff]  ;;  %v157_v46 = vld [vmem:[#allocation2 + $0x298] sm:$0xff] }
  0xbb   :  { %2029 = vmatprep.subr.bf16.mxu0 %v2028_v39  ;;  %1891 = vmatpush1.bf16.msra.mxu1 %v1890_v51  ;;  %v2048_v39 = vpack.c.bf16 %v436_v31, %v434_v27  ;;  %v91_v51 = vld [vmem:[#allocation2 + $0x88] sm:$0xff]  ;;  %v98_v27 = vld [vmem:[#allocation2 + $0xc0] sm:$0xff]  ;;  %v464_v43 = vld [vmem:[#allocation5 + $0x918] sm:$0xff] }
  0xbc   :  { %1893 = vmatprep.subr.bf16.mxu1 %v1892_v55  ;;  %v297_v55 = vld [vmem:[#allocation5 + $0x3e0] sm:$0xff]  ;;  %v147_v31 = vld [vmem:[#allocation2 + $0x248] sm:$0xff] }
  0xbd   :  { %v1914_v61 = vpack.c.bf16 %v299_v56, %v297_v55  ;;  %v459_v40 = vld [vmem:[#allocation5 + $0x8f0] sm:$0xff]  ;;  %v168_v56 = vld [vmem:[#allocation2 + $0x2f0] sm:$0xff] }
  0xbe   :  { %2031 = vmatpush1.bf16.msra.mxu0 %v2030_v48  ;;  %v2050_v48 = vpack.c.bf16 %v435_v37, %v433_v36  ;;  %v146_v36 = vld [vmem:[#allocation2 + $0x240] sm:$0xff]  ;;  %v109_v37 = vld [vmem:[#allocation2 + $0x118] sm:$0xff]  ;;  %v131_v57 = vld [vmem:[#allocation2 + $0x1c8] sm:$0xff] }
  0xbf   :  { %2033 = vmatprep.subr.bf16.mxu0 %v2032_v53  ;;  %1895 = vmatpush1.bf16.msra.mxu1 %v1894_v1  ;;  %v439_v53 = vld [vmem:[#allocation5 + $0x850] sm:$0xff] }
  0xc0   :  { %1897 = vmatprep.subr.bf16.mxu1 %v1896_v4  ;;  %v2054_v60 = vpack.c.bf16 %v439_v53, %v437_v49  ;;  %v443_v1 = vld [vmem:[#allocation5 + $0x870] sm:$0xff]  ;;  %v114_v4 = vld [vmem:[#allocation2 + $0x140] sm:$0xff]  ;;  %v461_v49 = vld [vmem:[#allocation5 + $0x900] sm:$0xff] }
  0xc1   :  { %v2058_v5 = vpack.c.bf16 %v443_v1, %v441_v0  ;;  %v468_v53 = vld [vmem:[#allocation5 + $0x938] sm:$0xff]  ;;  %v143_v0 = vld [vmem:[#allocation2 + $0x228] sm:$0xff] }
  0xc2   :  { %2035 = vmatpush1.bf16.msra.mxu0 %v2034_v62  ;;  %v102_v62 = vld [vmem:[#allocation2 + $0xe0] sm:$0xff] }
  0xc3   :  { %2037 = vmatprep.subr.bf16.mxu0 %v2036_v2  ;;  %1899 = vmatpush1.bf16.msra.mxu1 %v1898_v13  ;;  %v446_v2 = vld [vmem:[#allocation5 + $0x888] sm:$0xff]  ;;  %v452_v13 = vld [vmem:[#allocation5 + $0x8b8] sm:$0xff] }
  0xc4   :  { %1901 = vmatprep.subr.bf16.mxu1 %v1900_v16  ;;  %v2060_v8 = vpack.c.bf16 %v448_v3, %v446_v2  ;;  %v124_v16 = vld [vmem:[#allocation2 + $0x190] sm:$0xff]  ;;  %v2064_v18 = vpack.c.bf16 %v452_v13, %v450_v12  ;;  %v142_v2 = vld [vmem:[#allocation2 + $0x220] sm:$0xff]  ;;  %v473_v12 = vld [vmem:[#allocation5 + $0x960] sm:$0xff] }
  0xc5   :  { %v475_v13 = vld [vmem:[#allocation5 + $0x970] sm:$0xff] }
  0xc6   :  { %2039 = vmatpush1.bf16.msra.mxu0 %v2038_v10  ;;  %v447_v10 = vld [vmem:[#allocation5 + $0x890] sm:$0xff] }
  0xc7   :  { %2041 = vmatprep.subr.bf16.mxu0 %v2040_v14  ;;  %1903 = vmatpush1.bf16.msra.mxu1 %v1902_v25  ;;  %v88_v14 = vld [vmem:[#allocation2 + $0x70] sm:$0xff]  ;;  %v2062_v15 = vpack.c.bf16 %v447_v10, %v445_v9  ;;  %v2066_v25 = vpack.c.bf16 %v451_v20, %v449_v19  ;;  %v153_v10 = vld [vmem:[#allocation2 + $0x278] sm:$0xff] }
  0xc8   :  { %1905 = vmatprep.subr.bf16.mxu1 %v1904_v28  ;;  %v477_v20 = vld [vmem:[#allocation5 + $0x980] sm:$0xff] }
  0xca   :  { %2043 = vmatpush1.bf16.msra.mxu0 %v2042_v22  ;;  %v454_v22 = vld [vmem:[#allocation5 + $0x8c8] sm:$0xff] }
  0xcb   :  { %2045 = vmatprep.subr.bf16.mxu0 %v2044_v26  ;;  %1907 = vmatpush1.bf16.msra.mxu1 %v1906_v38  ;;  %v135_v26 = vld [vmem:[#allocation2 + $0x1e8] sm:$0xff]  ;;  %v2068_v28 = vpack.c.bf16 %v456_v23, %v454_v22  ;;  %v2072_v38 = vpack.c.bf16 %v460_v33, %v458_v32  ;;  %v482_v22 = vld [vmem:[#allocation5 + $0x9a8] sm:$0xff]  ;;  %v484_v23 = vld [vmem:[#allocation5 + $0x9b8] sm:$0xff] }
  0xcc   :  { %1909 = vmatprep.subr.bf16.mxu1 %v1908_v41  ;;  %v158_v41 = vld [vmem:[#allocation2 + $0x2a0] sm:$0xff]  ;;  %v485_v32 = vld [vmem:[#allocation5 + $0x9c0] sm:$0xff]  ;;  %v487_v33 = vld [vmem:[#allocation5 + $0x9d0] sm:$0xff] }
  0xcd   :  { %959 = vmatmul.mubr.f32.vlgmr.msra.gmra.mrb[0].mxu0 %v80_v34  ;;  %v110_v34 = vld [vmem:[#allocation2 + $0x120] sm:$0xff] }
  0xce   :  { %2047 = vmatpush1.bf16.msra.mxu0 %v2046_v35  ;;  %964 = vmatprep.mubr.f32.mxu0 %v92_v47  ;;  %v2070_v35 = vpack.c.bf16 %v455_v30, %v453_v29  ;;  %v120_v47 = vld [vmem:[#allocation2 + $0x170] sm:$0xff] }
  0xcf   :  { %2049 = vmatprep.subr.bf16.mxu0 %v2048_v39  ;;  %1911 = vmatpush1.bf16.msra.mxu1 %v1910_v50  ;;  %v457_v39 = vld [vmem:[#allocation5 + $0x8e0] sm:$0xff]  ;;  %v463_v50 = vld [vmem:[#allocation5 + $0x910] sm:$0xff]  ;;  %v488_v29 = vld [vmem:[#allocation5 + $0x9d8] sm:$0xff] }
  0xd0   :  { %1913 = vmatprep.subr.bf16.mxu1 %v1912_v54  ;;  %v2074_v45 = vpack.c.bf16 %v459_v40, %v457_v39  ;;  %v132_v54 = vld [vmem:[#allocation2 + $0x1d0] sm:$0xff]  ;;  %v2078_v55 = vpack.c.bf16 %v463_v50, %v461_v49  ;;  %v491_v39 = vld [vmem:[#allocation5 + $0x9f0] sm:$0xff]  ;;  %v494_v40 = vld [vmem:[#allocation5 + $0xa08] sm:$0xff] }
  0xd1   :  { %965 = vmatmul.mubr.f32.gmra.mrb[2].mxu0 %v91_v51  ;;  %v169_v51 = vld [vmem:[#allocation2 + $0x2f8] sm:$0xff] }
  0xd2   :  { %2051 = vmatpush1.bf16.msra.mxu0 %v2050_v48  ;;  %970 = vmatprep.mubr.f32.mxu0 %v103_v59  ;;  %v2076_v48 = vpack.c.bf16 %v464_v43, %v462_v42  ;;  %v465_v59 = vld [vmem:[#allocation5 + $0x920] sm:$0xff] }
  0xd3   :  { %2053 = vmatprep.subr.bf16.mxu0 %v2052_v52  ;;  %1915 = vmatpush1.bf16.msra.mxu1 %v1914_v61  ;;  %v466_v52 = vld [vmem:[#allocation5 + $0x928] sm:$0xff]  ;;  %v83_v61 = vld [vmem:[#allocation2 + $0x48] sm:$0xff]  ;;  %v93_v49 = vld [vmem:[#allocation2 + $0x98] sm:$0xff] }
  0xd4   :  { %v2080_v58 = vpack.c.bf16 %v468_v53, %v466_v52  ;;  %v105_v50 = vld [vmem:[#allocation2 + $0xf8] sm:$0xff]  ;;  %v116_v52 = vld [vmem:[#allocation2 + $0x150] sm:$0xff]  ;;  %v115_v53 = vld [vmem:[#allocation2 + $0x148] sm:$0xff] }
  0xd5   :  { %971 = vmatmul.mubr.f32.gmra.mrb[4].mxu0 %v102_v62  ;;  %v470_v62 = vld [vmem:[#allocation5 + $0x948] sm:$0xff] }
  0xd6   :  { %2055 = vmatpush1.bf16.msra.mxu0 %v2054_v60  ;;  %976 = vmatprep.mubr.f32.mxu0 %v114_v4  ;;  %v467_v60 = vld [vmem:[#allocation5 + $0x930] sm:$0xff]  ;;  %v469_v4 = vld [vmem:[#allocation5 + $0x940] sm:$0xff] }
  0xd7   :  { %2057 = vmatprep.subr.bf16.mxu0 %v2056_v63  ;;  %721 = vmatmul.mubr.f32.vlgmr.msra.gmra.mrb[0].mxu1 %v76_v6  ;;  %v472_v63 = vld [vmem:[#allocation5 + $0x958] sm:$0xff]  ;;  %v2082_v1 = vpack.c.bf16 %v467_v60, %v465_v59  ;;  %v154_v6 = vld [vmem:[#allocation2 + $0x280] sm:$0xff] }
  0xd8   :  { %726 = vmatprep.mubr.f32.mxu1 %v88_v14  ;;  %v2084_v3 = vpack.c.bf16 %v472_v63, %v470_v62  ;;  %v165_v14 = vld [vmem:[#allocation2 + $0x2d8] sm:$0xff]  ;;  %v148_v59 = vld [vmem:[#allocation2 + $0x250] sm:$0xff]  ;;  %v171_v62 = vld [vmem:[#allocation2 + $0x308] sm:$0xff] }
  0xd9   :  { %977 = vmatmul.mubr.f32.gmra.mrb[6].mxu0 %v113_v7  ;;  %v474_v7 = vld [vmem:[#allocation5 + $0x968] sm:$0xff]  ;;  %v160_v60 = vld [vmem:[#allocation2 + $0x2b0] sm:$0xff] }
  0xda   :  { %2059 = vmatpush1.bf16.msra.mxu0 %v2058_v5  ;;  %982 = vmatprep.mubr.f32.mxu0 %v125_v11  ;;  %v471_v5 = vld [vmem:[#allocation5 + $0x950] sm:$0xff]  ;;  %v170_v63 = vld [vmem:[#allocation2 + $0x300] sm:$0xff] }
  0xdb   :  { %2061 = vmatprep.subr.bf16.mxu0 %v2060_v8  ;;  %727 = vmatmul.mubr.f32.gmra.mrb[2].mxu1 %v87_v17  ;;  %v476_v8 = vld [vmem:[#allocation5 + $0x978] sm:$0xff]  ;;  %v2086_v9 = vpack.c.bf16 %v471_v5, %v469_v4  ;;  %v2090_v17 = vpack.c.bf16 %v475_v13, %v473_v12  ;;  %v1285_v4 = vld [vmem:[%s2847_s3 + $0x80] sm:$0xff]  ;;  %v1286_v5 = vld [vmem:[%s2847_s3 + $0x88] sm:$0xff] }
  0xdc   :  { %732 = vmatprep.mubr.f32.mxu1 %v99_v24  ;;  %v2088_v11 = vpack.c.bf16 %v476_v8, %v474_v7  ;;  %v2112_v7 = vpack.c.bf16 %v1286_v5, %v1285_v4  ;;  %v1270_v8 = vld [vmem:[%s2847_s3 + $0x8] sm:$0xff]  ;;  %v1288_v12 = vld [vmem:[%s2847_s3 + $0x98] sm:$0xff]  ;;  %v1271_v13 = vld [vmem:[%s2847_s3 + $0x10] sm:$0xff] }
  0xdd   :  { %983 = vmatmul.mubr.f32.gmra.mrb[8].mxu0 %v124_v16  ;;  %v480_v16 = vld [vmem:[#allocation5 + $0x998] sm:$0xff] }
  0xde   :  { %2063 = vmatpush1.bf16.msra.mxu0 %v2062_v15  ;;  %988 = vmatprep.mubr.f32.mxu0 %v136_v21  ;;  %v478_v15 = vld [vmem:[#allocation5 + $0x988] sm:$0xff]  ;;  %v479_v21 = vld [vmem:[#allocation5 + $0x990] sm:$0xff] }
  0xdf   :  { %2065 = vmatprep.subr.bf16.mxu0 %v2064_v18  ;;  %733 = vmatmul.mubr.f32.gmra.mrb[4].mxu1 %v98_v27  ;;  %v164_v18 = vld [vmem:[#allocation2 + $0x2d0] sm:$0xff]  ;;  %v2092_v19 = vpack.c.bf16 %v480_v16, %v478_v15  ;;  %v2094_v24 = vpack.c.bf16 %v479_v21, %v477_v20  ;;  %v483_v27 = vld [vmem:[#allocation5 + $0x9b0] sm:$0xff]  ;;  %v1272_v15 = vld [vmem:[%s2847_s3 + $0x18] sm:$0xff] }
  0xe0   :  { %738 = vmatprep.mubr.f32.mxu1 %v110_v34  ;;  %v490_v34 = vld [vmem:[#allocation5 + $0x9e8] sm:$0xff]  ;;  %2113 = vmatprep.subr.bf16.mxu1 %v2112_v7  ;;  %v2118_v16 = vpack.c.bf16 %v1272_v15, %v1271_v13 }
  0xe1   :  { %989 = vmatmul.mubr.f32.gmra.mrb[10].mxu0 %v135_v26  ;;  %v481_v26 = vld [vmem:[#allocation5 + $0x9a0] sm:$0xff]  ;;  %v1273_v20 = vld [vmem:[%s2847_s3 + $0x20] sm:$0xff] }
  0xe2   :  { %2067 = vmatpush1.bf16.msra.mxu0 %v2066_v25  ;;  %994 = vmatprep.mubr.f32.mxu0 %v147_v31  ;;  %v2096_v25 = vpack.c.bf16 %v484_v23, %v482_v22  ;;  %v2098_v30 = vpack.c.bf16 %v483_v27, %v481_v26  ;;  %v1274_v22 = vld [vmem:[%s2847_s3 + $0x28] sm:$0xff]  ;;  %v1292_v26 = vld [vmem:[%s2847_s3 + $0xb8] sm:$0xff] }
  0xe3   :  { %2069 = vmatprep.subr.bf16.mxu0 %v2068_v28  ;;  %739 = vmatmul.mubr.f32.gmra.mrb[6].mxu1 %v109_v37  ;;  %v486_v28 = vld [vmem:[#allocation5 + $0x9c8] sm:$0xff]  ;;  %v2122_v23 = vpack.c.bf16 %v1274_v22, %v1273_v20 }
  0xe4   :  { %744 = vmatprep.mubr.f32.mxu1 %v121_v44  ;;  %v2100_v31 = vpack.c.bf16 %v488_v29, %v486_v28  ;;  %v493_v44 = vld [vmem:[#allocation5 + $0xa00] sm:$0xff]  ;;  %v1275_v28 = vld [vmem:[%s2847_s3 + $0x30] sm:$0xff] }
  0xe5   :  { %995 = vmatmul.mubr.f32.gmra.mrb[12].mxu0 %v146_v36  ;;  %v2102_v36 = vpack.c.bf16 %v487_v33, %v485_v32  ;;  %v1276_v29 = vld [vmem:[%s2847_s3 + $0x38] sm:$0xff]  ;;  %v1293_v32 = vld [vmem:[%s2847_s3 + $0xc0] sm:$0xff]  ;;  %v1294_v33 = vld [vmem:[%s2847_s3 + $0xc8] sm:$0xff] }
  0xe6   :  { %2071 = vmatpush1.bf16.msra.mxu0 %v2070_v35  ;;  %1000 = vmatprep.mubr.f32.mxu0 %v158_v41  ;;  %v492_v35 = vld [vmem:[#allocation5 + $0x9f8] sm:$0xff] }
  0xe7   :  { %2073 = vmatprep.subr.bf16.mxu0 %v2072_v38  ;;  %745 = vmatmul.mubr.f32.gmra.mrb[8].mxu1 %v120_v47  ;;  %v2104_v37 = vpack.c.bf16 %v492_v35, %v490_v34  ;;  %v489_v38 = vld [vmem:[#allocation5 + $0x9e0] sm:$0xff]  ;;  %v496_v41 = vld [vmem:[#allocation5 + $0xa18] sm:$0xff]  ;;  %v2128_v34 = vpack.c.bf16 %v1294_v33, %v1293_v32  ;;  %v1277_v35 = vld [vmem:[%s2847_s3 + $0x40] sm:$0xff] }
  0xe8   :  { %750 = vmatprep.mubr.f32.mxu1 %v132_v54  ;;  %v2106_v42 = vpack.c.bf16 %v491_v39, %v489_v38  ;;  %v2108_v43 = vpack.c.bf16 %v496_v41, %v494_v40  ;;  %v127_v54 = vld [vmem:[#allocation2 + $0x1a8] sm:$0xff]  ;;  %v172_v39 = vld [vmem:[#allocation2 + $0x310] sm:$0xff]  ;;  %v1296_v41 = vld [vmem:[%s2847_s3 + $0xd8] sm:$0xff] }
  0xe9   :  { %1001 = vmatmul.mubr.f32.gmra.mrb[14].mxu0 %v157_v46  ;;  %v82_v46 = vld [vmem:[#allocation2 + $0x40] sm:$0xff]  ;;  %v1295_v40 = vld [vmem:[%s2847_s3 + $0xd0] sm:$0xff] }
  0xea   :  { %2075 = vmatpush1.bf16.msra.mxu0 %v2074_v45  ;;  %1006 = vmatprep.mubr.f32.mxu0 %v169_v51  ;;  %v495_v45 = vld [vmem:[#allocation5 + $0xa10] sm:$0xff]  ;;  %v104_v51 = vld [vmem:[#allocation2 + $0xf0] sm:$0xff] }
  0xeb   :  { %2077 = vmatprep.subr.bf16.mxu0 %v2076_v48  ;;  %751 = vmatmul.mubr.f32.gmra.mrb[10].mxu1 %v131_v57  ;;  %v2110_v47 = vpack.c.bf16 %v495_v45, %v493_v44  ;;  %v94_v48 = vld [vmem:[#allocation2 + $0xa0] sm:$0xff]  ;;  %v137_v57 = vld [vmem:[#allocation2 + $0x1f8] sm:$0xff] }
  0xec   :  { %756 = vmatprep.mubr.f32.mxu1 %v143_v0  ;;  %v2432_v0 = vmov 0.0   ;;  %v1280_v44 = vld [vmem:[%s2847_s3 + $0x58] sm:$0xff]  ;;  %v1297_v45 = vld [vmem:[%s2847_s3 + $0xe0] sm:$0xff] }
  0xed   :  { %1007 = vmatmul.mubr.f32.gmra.mrb[16].mxu0 %v168_v56  ;;  %v138_v56 = vld [vmem:[#allocation2 + $0x200] sm:$0xff] }
  0xee   :  { %2079 = vmatpush1.bf16.msra.mxu0 %v2078_v55  ;;  %1077 = vmatprep.mubr.f32.mxu0 %v83_v61  ;;  %v126_v55 = vld [vmem:[#allocation2 + $0x1a0] sm:$0xff]  ;;  %v159_v61 = vld [vmem:[#allocation2 + $0x2a8] sm:$0xff] }
  0xef   :  { %2081 = vmatprep.subr.bf16.mxu0 %v2080_v58  ;;  %757 = vmatmul.mubr.f32.gmra.mrb[12].mxu1 %v142_v2  ;;  %v149_v58 = vld [vmem:[#allocation2 + $0x258] sm:$0xff]  ;;  %v95_v2 = vld [vmem:[#allocation2 + $0xa8] sm:$0xff] }
  0xf0   :  { %762 = vmatprep.mubr.f32.mxu1 %v154_v6  ;;  %v1269_v6 = vld [vmem:[%s2847_s3] sm:$0xff] }
  0xf2   :  { %2083 = vmatpush1.bf16.msra.mxu0 %v2082_v1  ;;  %v84_v1 = vld [vmem:[#allocation2 + $0x50] sm:$0xff] }
  0xf3   :  { %2085 = vmatprep.subr.bf16.mxu0 %v2084_v3  ;;  %763 = vmatmul.mubr.f32.gmra.mrb[14].mxu1 %v153_v10  ;;  %v106_v3 = vld [vmem:[#allocation2 + $0x100] sm:$0xff]  ;;  %v117_v10 = vld [vmem:[#allocation2 + $0x158] sm:$0xff] }
  0xf4   :  { %768 = vmatprep.mubr.f32.mxu1 %v165_v14 }
  0xf6   :  { %2087 = vmatpush1.bf16.msra.mxu0 %v2086_v9  ;;  %v2114_v9 = vpack.c.bf16 %v1270_v8, %v1269_v6 }
  0xf7   :  { %2089 = vmatprep.subr.bf16.mxu0 %v2088_v11  ;;  %769 = vmatmul.mubr.f32.gmra.mrb[16].mxu1 %v164_v18  ;;  %v1287_v11 = vld [vmem:[%s2847_s3 + $0x90] sm:$0xff]  ;;  %v1289_v18 = vld [vmem:[%s2847_s3 + $0xa0] sm:$0xff] }
  0xf8   :  { %2115 = vmatpush3.bf16.msra.mxu1 %v2114_v9  ;;  %v2116_v14 = vpack.c.bf16 %v1288_v12, %v1287_v11 }
  0xfa   :  { %2091 = vmatpush1.bf16.msra.mxu0 %v2090_v17  ;;  %v128_v17 = vld [vmem:[#allocation2 + $0x1b0] sm:$0xff]  ;;  %2117 = vmatprep.subr.bf16.mxu1 %v2116_v14 }
  0xfb   :  { %2093 = vmatprep.subr.bf16.mxu0 %v2092_v19  ;;  %v1290_v19 = vld [vmem:[%s2847_s3 + $0xa8] sm:$0xff] }
  0xfc   :  { %2119 = vmatpush3.bf16.msra.mxu1 %v2118_v16  ;;  %v2120_v21 = vpack.c.bf16 %v1290_v19, %v1289_v18  ;;  %v499_v16 = vlaneseq  ;;  %v497_v19 = vld [vmem:[#allocation7] sm:$0x3] }
  0xfe   :  { %2095 = vmatpush1.bf16.msra.mxu0 %v2094_v24  ;;  %2121 = vmatprep.subr.bf16.mxu1 %v2120_v21  ;;  %v139_v24 = vld [vmem:[#allocation2 + $0x208] sm:$0xff] }
  0xff   :  { %2097 = vmatprep.subr.bf16.mxu0 %v2096_v25  ;;  %v1291_v25 = vld [vmem:[%s2847_s3 + $0xb0] sm:$0xff] }
 0x100   :  { %2123 = vmatpush3.bf16.msra.mxu1 %v2122_v23  ;;  %v2124_v27 = vpack.c.bf16 %v1292_v26, %v1291_v25 }
 0x102   :  { %2099 = vmatpush1.bf16.msra.mxu0 %v2098_v30  ;;  %2125 = vmatprep.subr.bf16.mxu1 %v2124_v27  ;;  %v150_v30 = vld [vmem:[#allocation2 + $0x260] sm:$0xff] }
 0x103   :  { %2101 = vmatprep.subr.bf16.mxu0 %v2100_v31  ;;  %v2126_v31 = vpack.c.bf16 %v1276_v29, %v1275_v28  ;;  %v1501_v28 = vld [vmem:[#allocation8] sm:$0xff]  ;;  %v1503_v29 = vld [vmem:[#allocation8 + $0x10] sm:$0xff] }
 0x105   :  { %2127 = vmatpush3.bf16.msra.mxu1 %v2126_v31 }
 0x106   :  { %2103 = vmatpush1.bf16.msra.mxu0 %v2102_v36  ;;  %2129 = vmatprep.subr.bf16.mxu1 %v2128_v34  ;;  %v1278_v36 = vld [vmem:[%s2847_s3 + $0x48] sm:$0xff] }
 0x107   :  { %2105 = vmatprep.subr.bf16.mxu0 %v2104_v37  ;;  %v161_v37 = vld [vmem:[#allocation2 + $0x2b8] sm:$0xff]  ;;  %v2130_v38 = vpack.c.bf16 %v1278_v36, %v1277_v35  ;;  %v2146_v35 = vpack.c.bf16 %v1503_v29, %v1501_v28 }
 0x109   :  { %2131 = vmatpush3.bf16.msra.mxu1 %v2130_v38 }
 0x10a   :  { %2107 = vmatpush1.bf16.msra.mxu0 %v2106_v42  ;;  %v2132_v42 = vpack.c.bf16 %v1296_v41, %v1295_v40 }
 0x10b   :  { %2109 = vmatprep.subr.bf16.mxu0 %v2108_v43  ;;  %v1279_v43 = vld [vmem:[%s2847_s3 + $0x50] sm:$0xff] }
 0x10c   :  { %2133 = vmatprep.subr.bf16.mxu1 %v2132_v42 }
 0x10d   :  { %1078 = vmatmul.mubr.f32.vlgmr.msra.gmra.mrb[0].mxu0 %v82_v46  ;;  %v2134_v46 = vpack.c.bf16 %v1280_v44, %v1279_v43 }
 0x10e   :  { %2111 = vmatpush1.bf16.msra.mxu0 %v2110_v47  ;;  %1083 = vmatprep.mubr.f32.mxu0 %v94_v48  ;;  %v1298_v47 = vld [vmem:[%s2847_s3 + $0xe8] sm:$0xff]  ;;  %v1281_v48 = vld [vmem:[%s2847_s3 + $0x60] sm:$0xff] }
 0x10f   :  { %2135 = vmatpush3.bf16.msra.mxu1 %v2134_v46 }
 0x111   :  { %1084 = vmatmul.mubr.f32.gmra.mrb[2].mxu0 %v93_v49  ;;  %v1282_v49 = vld [vmem:[%s2847_s3 + $0x68] sm:$0xff] }
 0x112   :  { %1089 = vmatprep.mubr.f32.mxu0 %v105_v50  ;;  %v2136_v50 = vpack.c.bf16 %v1298_v47, %v1297_v45 }
 0x114   :  { %2137 = vmatprep.subr.bf16.mxu1 %v2136_v50 }
 0x115   :  { %1090 = vmatmul.mubr.f32.gmra.mrb[4].mxu0 %v104_v51  ;;  %v2138_v51 = vpack.c.bf16 %v1282_v49, %v1281_v48 }
 0x116   :  { %1095 = vmatprep.mubr.f32.mxu0 %v116_v52  ;;  %v1299_v52 = vld [vmem:[%s2847_s3 + $0xf0] sm:$0xff] }
 0x117   :  { %2139 = vmatpush3.bf16.msra.mxu1 %v2138_v51 }
 0x119   :  { %1096 = vmatmul.mubr.f32.gmra.mrb[6].mxu0 %v115_v53  ;;  %v1300_v53 = vld [vmem:[%s2847_s3 + $0xf8] sm:$0xff] }
 0x11a   :  { %1101 = vmatprep.mubr.f32.mxu0 %v127_v54  ;;  %v2140_v54 = vpack.c.bf16 %v1300_v53, %v1299_v52 }
 0x11c   :  { %2141 = vmatprep.subr.bf16.mxu1 %v2140_v54 }
 0x11d   :  { %1102 = vmatmul.mubr.f32.gmra.mrb[8].mxu0 %v126_v55  ;;  %v1283_v55 = vld [vmem:[%s2847_s3 + $0x70] sm:$0xff] }
 0x11e   :  { %1107 = vmatprep.mubr.f32.mxu0 %v138_v56  ;;  %v1284_v56 = vld [vmem:[%s2847_s3 + $0x78] sm:$0xff]  ;;  %s2433_s3 = smov [#allocation10]  }
 0x11f   :  { %s1697_s27 = sshll.u32 %s2433_s3, 4  ;;  %s1698_s27 = int_to_ptr.vmem [resolvable:$true] %s1697_s27 }
 0x120   :  { %s2394_s30 = scalar_lea.vmem %s1698_s27, 2304  ;;  %p2399_p5 = scmp.lt.s32.totalorder %s1698_s27, %s1698_s27 }
 0x121   :  { %1108 = vmatmul.mubr.f32.gmra.mrb[10].mxu0 %v137_v57  ;;  %v2142_v57 = vpack.c.bf16 %v1284_v56, %v1283_v55  ;;  %p2395_p4 = scmp.ne.s32.totalorder %s1698_s27, %s2394_s30  ;;  %p2400_p6 = scmp.lt.s32.totalorder %s2394_s30, %s2394_s30 }
 0x122   :  { %1113 = vmatprep.mubr.f32.mxu0 %v149_v58  ;;  %v1502_v58 = vld [vmem:[#allocation8 + $0x8] sm:$0xff] }
 0x123   :  { %2143 = vmatpush3.bf16.msra.mxu1 %v2142_v57  ;;  %p2401_p7 = por %p2400_p6, %p2399_p5 }
 0x125   :  { %1114 = vmatmul.mubr.f32.gmra.mrb[12].mxu0 %v148_v59  ;;  %v1504_v59 = vld [vmem:[#allocation8 + $0x18] sm:$0xff]  ;;  %p2402_p8 = pnand %p2401_p7, %p2395_p4 }
 0x126   :  { %1119 = vmatprep.mubr.f32.mxu0 %v160_v60 }
 0x129   :  { %1120 = vmatmul.mubr.f32.gmra.mrb[14].mxu0 %v159_v61  ;;  %v2144_v61 = vpack.c.bf16 %v1504_v59, %v1502_v58 }
 0x12a   :  { %1125 = vmatprep.mubr.f32.mxu0 %v171_v62 }
 0x12b   :  { %2145 = vmatprep.subr.bf16.mxu1 %v2144_v61 }
 0x12d   :  { %1126 = vmatmul.mubr.f32.gmra.mrb[16].mxu0 %v170_v63 }
 0x12e   :  { %1196 = vmatprep.mubr.f32.mxu0 %v2432_v0 }
 0x131   :  { %1711 = vmatmul.mubr.msk.f32.vlgmr.msra.gmra.mrb[0].mxu0 %vm509_vm0, %v84_v1 }
 0x132   :  { %1202 = vmatprep.mubr.f32.mxu0 %v2432_v0 }
 0x135   :  { %1712 = vmatmul.mubr.msk.f32.gmra.mrb[2].mxu0 %vm509_vm0, %v95_v2 }
 0x136   :  { %1208 = vmatprep.mubr.f32.mxu0 %v2432_v0 }
 0x139   :  { %1713 = vmatmul.mubr.msk.f32.gmra.mrb[4].mxu0 %vm509_vm0, %v106_v3 }
 0x13a   :  { %1214 = vmatprep.mubr.f32.mxu0 %v2432_v0 }
 0x13d   :  { %1714 = vmatmul.mubr.msk.f32.gmra.mrb[6].mxu0 %vm509_vm0, %v117_v10 }
 0x13e   :  { %1220 = vmatprep.mubr.f32.mxu0 %v2432_v0 }
 0x141   :  { %1715 = vmatmul.mubr.msk.f32.gmra.mrb[8].mxu0 %vm509_vm0, %v128_v17  ;;  %v500_v17 = vshrl.u32 %v499_v16, 7 }
 0x142   :  { %1226 = vmatprep.mubr.f32.mxu0 %v2432_v0 }
 0x143   :  { %v501_v18 = vsub.s32 0, %v500_v17  ;;  %v505_v20 = vsub.s32 1, %v500_v17 }
 0x145   :  { %1716 = vmatmul.mubr.msk.f32.gmra.mrb[10].mxu0 %vm509_vm0, %v139_v24  ;;  %v2655_v21 = vrot.slane %v497_v19, %v501_v18  ;;  %v2657_v22 = vrot.slane %v497_v19, %v505_v20 }
 0x146   :  { %1232 = vmatprep.mubr.f32.mxu0 %v2432_v0 }
 0x149   :  { %1717 = vmatmul.mubr.msk.f32.gmra.mrb[12].mxu0 %vm509_vm0, %v150_v30 }
 0x14a   :  { %1238 = vmatprep.mubr.f32.mxu0 %v2432_v0 }
 0x14d   :  { %1718 = vmatmul.mubr.msk.f32.gmra.mrb[14].mxu0 %vm509_vm0, %v161_v37 }
 0x14e   :  { %1244 = vmatprep.mubr.f32.mxu0 %v2432_v0 }
 0x151   :  { %1719 = vmatmul.mubr.msk.f32.gmra.mrb[16].mxu0 %vm509_vm0, %v172_v39 }
 0x1aa   :  { %v722_v60 = vpop.f32.mrb[0].mxu1 }
 0x1ab   :  { %v724_v62 = vpop.f32.mrb[1].mxu1  ;;  %v2152_v23 = vadd.f32 %v722_v60, %v2655_v21 }
 0x1ac   :  { %v2154_v24 = vadd.f32 %v724_v62, %v2657_v22 }
 0x1ae   :  { %v728_v63 = vpop.f32.mrb[2].mxu1 }
 0x1af   :  { %v730_v1 = vpop.f32.mrb[3].mxu1  ;;  %v2156_v31 = vadd.f32 %v728_v63, %v2655_v21 }
 0x1b0   :  { %v2158_v32 = vadd.f32 %v730_v1, %v2657_v22 }
 0x1b2   :  { %v734_v2 = vpop.f32.mrb[4].mxu1 }
 0x1b3   :  { %v736_v3 = vpop.f32.mrb[5].mxu1  ;;  %v2160_v40 = vadd.f32 %v734_v2, %v2655_v21 }
 0x1b4   :  { %v2162_v41 = vadd.f32 %v736_v3, %v2657_v22 }
 0x1b6   :  { %v740_v4 = vpop.f32.mrb[6].mxu1 }
 0x1b7   :  { %v742_v5 = vpop.f32.mrb[7].mxu1  ;;  %v2164_v48 = vadd.f32 %v740_v4, %v2655_v21 }
 0x1b8   :  { %v2166_v49 = vadd.f32 %v742_v5, %v2657_v22 }
 0x1ba   :  { %v746_v6 = vpop.f32.mrb[8].mxu1 }
 0x1bb   :  { %v748_v7 = vpop.f32.mrb[9].mxu1  ;;  %v2168_v56 = vadd.f32 %v746_v6, %v2655_v21 }
 0x1bc   :  { %v2170_v57 = vadd.f32 %v748_v7, %v2657_v22 }
 0x1be   :  { %v2639_v8 = vpop.f32.mrb[10].mxu1 }
 0x1bf   :  { %v2641_v9 = vpop.f32.mrb[11].mxu1  ;;  %v2172_v1 = vadd.f32 %v2639_v8, %v2655_v21 }
 0x1c0   :  { %v2174_v2 = vadd.f32 %v2641_v9, %v2657_v22 }
 0x1c2   :  { %v2643_v10 = vpop.f32.mrb[12].mxu1 }
 0x1c3   :  { %v2645_v11 = vpop.f32.mrb[13].mxu1  ;;  %v2176_v8 = vadd.f32 %v2643_v10, %v2655_v21 }
 0x1c4   :  { %v2178_v9 = vadd.f32 %v2645_v11, %v2657_v22 }
 0x1c6   :  { %v2647_v12 = vpop.f32.mrb[14].mxu1 }
 0x1c7   :  { %v2649_v13 = vpop.f32.mrb[15].mxu1  ;;  %v2180_v10 = vadd.f32 %v2647_v12, %v2655_v21 }
 0x1c8   :  { %v2182_v11 = vadd.f32 %v2649_v13, %v2657_v22 }
 0x1ca   :  { %v2651_v14 = vpop.f32.mrb[16].mxu1 }
 0x1cb   :  { %v2653_v15 = vpop.f32.mrb[17].mxu1  ;;  %v2184_v12 = vadd.f32 %v2651_v14, %v2655_v21  ;;  %v1506_v21 = vld [vmem:[#allocation8 + $0x28] sm:$0xff] }
 0x1cc   :  { %v2186_v13 = vadd.f32 %v2653_v15, %v2657_v22  ;;  %v1508_v22 = vld [vmem:[#allocation8 + $0x38] sm:$0xff] }
 0x204   :  { %v1198_v25 = vpop.f32.mrb[0].mxu0 }
 0x205   :  { %v2661_v26 = vadd.f32 %v2152_v23, %v1198_v25  ;;  %v1200_v27 = vpop.f32.mrb[1].mxu0 }
 0x206   :  { %v2663_v30 = vadd.f32 %v2154_v24, %v1200_v27 }
 0x207   :  { %v1251_v36 = vmul.f32 %v2661_v26, %v2661_v26 }
 0x208   :  { %v1252_v33 = vmul.f32 %v2663_v30, %v2663_v30  ;;  %v1204_v34 = vpop.f32.mrb[2].mxu0 }
 0x209   :  { %v2671_v37 = vadd.f32 %v2156_v31, %v1204_v34  ;;  %v1206_v38 = vpop.f32.mrb[3].mxu0 }
 0x20a   :  { %v2673_v39 = vadd.f32 %v2158_v32, %v1206_v38  ;;  %1365 = vmatprep.mubr.f32.mxu1 %v1252_v33 }
 0x20b   :  { %1366 = vmatmul.mubr.f32.vlgmr.msra.gmra.mrb[18].mxu1 %v1251_v36  ;;  %v1253_v44 = vmul.f32 %v2671_v37, %v2671_v37 }
 0x20c   :  { %v1254_v42 = vmul.f32 %v2673_v39, %v2673_v39  ;;  %v1210_v43 = vpop.f32.mrb[4].mxu0  ;;  %2147 = vmatpush1.bf16.msra.mxu1 %v2146_v35 }
 0x20d   :  { %v2681_v45 = vadd.f32 %v2160_v40, %v1210_v43  ;;  %v1212_v46 = vpop.f32.mrb[5].mxu0  ;;  %v1507_v43 = vld [vmem:[#allocation8 + $0x30] sm:$0xff] }
 0x20e   :  { %v2683_v47 = vadd.f32 %v2162_v41, %v1212_v46  ;;  %1370 = vmatprep.mubr.f32.mxu1 %v1254_v42  ;;  %v2148_v41 = vpack.c.bf16 %v1508_v22, %v1506_v21  ;;  %v1505_v42 = vld [vmem:[#allocation8 + $0x20] sm:$0xff] }
 0x20f   :  { %1371 = vmatmul.mubr.f32.gmra.mrb[20].mxu1 %v1253_v44  ;;  %v1255_v52 = vmul.f32 %v2681_v45, %v2681_v45  ;;  %v2150_v44 = vpack.c.bf16 %v1507_v43, %v1505_v42 }
 0x210   :  { %v1256_v50 = vmul.f32 %v2683_v47, %v2683_v47  ;;  %v1216_v51 = vpop.f32.mrb[6].mxu0  ;;  %2149 = vmatprep.subr.bf16.mxu1 %v2148_v41 }
 0x211   :  { %v2691_v53 = vadd.f32 %v2164_v48, %v1216_v51  ;;  %v1218_v54 = vpop.f32.mrb[7].mxu0  ;;  %2151 = vmatpush1.bf16.msra.mxu1 %v2150_v44 }
 0x212   :  { %v2693_v55 = vadd.f32 %v2166_v49, %v1218_v54  ;;  %1375 = vmatprep.mubr.f32.mxu1 %v1256_v50 }
 0x213   :  { %1376 = vmatmul.mubr.f32.gmra.mrb[22].mxu1 %v1255_v52  ;;  %v1257_v60 = vmul.f32 %v2691_v53, %v2691_v53 }
 0x214   :  { %v1258_v58 = vmul.f32 %v2693_v55, %v2693_v55  ;;  %v1222_v59 = vpop.f32.mrb[8].mxu0 }
 0x215   :  { %v2701_v61 = vadd.f32 %v2168_v56, %v1222_v59  ;;  %v1224_v62 = vpop.f32.mrb[9].mxu0 }
 0x216   :  { %v2703_v63 = vadd.f32 %v2170_v57, %v1224_v62  ;;  %1380 = vmatprep.mubr.f32.mxu1 %v1258_v58 }
 0x217   :  { %1381 = vmatmul.mubr.f32.gmra.mrb[24].mxu1 %v1257_v60  ;;  %v1259_v5 = vmul.f32 %v2701_v61, %v2701_v61 }
 0x218   :  { %v1260_v3 = vmul.f32 %v2703_v63, %v2703_v63  ;;  %v1228_v4 = vpop.f32.mrb[10].mxu0 }
 0x219   :  { %v2713_v6 = vadd.f32 %v2172_v1, %v1228_v4  ;;  %v1230_v7 = vpop.f32.mrb[11].mxu0 }
 0x21a   :  { %v2715_v16 = vadd.f32 %v2174_v2, %v1230_v7  ;;  %1385 = vmatprep.mubr.f32.mxu1 %v1260_v3 }
 0x21b   :  { %1386 = vmatmul.mubr.f32.gmra.mrb[26].mxu1 %v1259_v5  ;;  %v1261_v19 = vmul.f32 %v2713_v6, %v2713_v6 }
 0x21c   :  { %v1262_v17 = vmul.f32 %v2715_v16, %v2715_v16  ;;  %v1234_v18 = vpop.f32.mrb[12].mxu0 }
 0x21d   :  { %v2725_v20 = vadd.f32 %v2176_v8, %v1234_v18  ;;  %v1236_v23 = vpop.f32.mrb[13].mxu0 }
 0x21e   :  { %v2727_v24 = vadd.f32 %v2178_v9, %v1236_v23  ;;  %1390 = vmatprep.mubr.f32.mxu1 %v1262_v17 }
 0x21f   :  { %1391 = vmatmul.mubr.f32.gmra.mrb[28].mxu1 %v1261_v19  ;;  %v1263_v28 = vmul.f32 %v2725_v20, %v2725_v20 }
 0x220   :  { %v1264_v25 = vmul.f32 %v2727_v24, %v2727_v24  ;;  %v1240_v27 = vpop.f32.mrb[14].mxu0 }
 0x221   :  { %v2737_v29 = vadd.f32 %v2180_v10, %v1240_v27  ;;  %v1242_v31 = vpop.f32.mrb[15].mxu0 }
 0x222   :  { %v2739_v32 = vadd.f32 %v2182_v11, %v1242_v31  ;;  %1395 = vmatprep.mubr.f32.mxu1 %v1264_v25 }
 0x223   :  { %1396 = vmatmul.mubr.f32.gmra.mrb[30].mxu1 %v1263_v28  ;;  %v1265_v35 = vmul.f32 %v2737_v29, %v2737_v29 }
 0x224   :  { %v1266_v33 = vmul.f32 %v2739_v32, %v2739_v32  ;;  %v1246_v34 = vpop.f32.mrb[16].mxu0 }
 0x225   :  { %v2749_v36 = vadd.f32 %v2184_v12, %v1246_v34  ;;  %v1248_v38 = vpop.f32.mrb[17].mxu0 }
 0x226   :  { %v2751_v40 = vadd.f32 %v2186_v13, %v1248_v38  ;;  %1400 = vmatprep.mubr.f32.mxu1 %v1266_v33 }
 0x227   :  { %1401 = vmatmul.mubr.f32.gmra.mrb[32].mxu1 %v1265_v35  ;;  %v1267_v15 = vmul.f32 %v2749_v36, %v2749_v36 }
 0x228   :  { %v1268_v14 = vmul.f32 %v2751_v40, %v2751_v40 }
 0x22a   :  { %1405 = vmatprep.mubr.f32.mxu1 %v1268_v14 }
 0x22b   :  { %1406 = vmatmul.mubr.f32.gmra.mrb[34].mxu1 %v1267_v15 }
 0x22c   :  { %1601 = vmatprep.mubr.f32.mxu1 %v2432_v0 }
 0x2de   :  { %v1761_v46 = vpop.f32.mrb[18].mxu1 }
 0x2df   :  { %v1762_v48 = vpop.f32.mrb[19].mxu1 }
 0x2e0   :  { %v1763_v49 = vadd.f32 %v1762_v48, %v1761_v46 }
 0x2e2   :  { %2270 = vrsqrt.f32 %v1763_v49  ;;  %v1474_v50 = vadd.f32 1.0, %v1763_v49  ;;  %v1764_v51 = vpop.f32.mrb[20].mxu1  ;;  %vm1413_vm1 = vcmp.eq.f32.partialorder %v1763_v49, inf  ;;  %v1416_v7 = vand.u32 2147483648, %v1763_v49 }
 0x2e3   :  { %v1765_v52 = vpop.f32.mrb[21].mxu1  ;;  %vm1415_vm2 = vcmp.eq.f32.partialorder %v1763_v49, 0.0 }
 0x2e4   :  { %v1766_v54 = vadd.f32 %v1765_v52, %v1764_v51  ;;  %2272 = vrcp.f32 %v1474_v50 }
 0x2e6   :  { %2274 = vrsqrt.f32 %v1766_v54  ;;  %v1767_v56 = vpop.f32.mrb[22].mxu1  ;;  %v1475_v58 = vadd.f32 1.0, %v1766_v54  ;;  %vm1420_vm4 = vcmp.eq.f32.partialorder %v1766_v54, inf  ;;  %v1423_v28 = vand.u32 2147483648, %v1766_v54 }
 0x2e7   :  { %v1768_v57 = vpop.f32.mrb[23].mxu1  ;;  %vm1422_vm5 = vcmp.eq.f32.partialorder %v1766_v54, 0.0 }
 0x2e8   :  { %v1769_v59 = vadd.f32 %v1768_v57, %v1767_v56  ;;  %2276 = vrcp.f32 %v1475_v58 }
 0x2ea   :  { %2278 = vrsqrt.f32 %v1769_v59  ;;  %v1770_v60 = vpop.f32.mrb[24].mxu1  ;;  %v1476_v1 = vadd.f32 1.0, %v1769_v59  ;;  %vm1427_vm6 = vcmp.eq.f32.partialorder %v1769_v59, inf  ;;  %v1430_v22 = vand.u32 2147483648, %v1769_v59 }
 0x2eb   :  { %v1771_v62 = vpop.f32.mrb[25].mxu1  ;;  %vm1429_vm7 = vcmp.eq.f32.partialorder %v1769_v59, 0.0 }
 0x2ec   :  { %v2271_v2 = vpop.eup %2270  ;;  %v2758_v3 = vadd.f32 %v1771_v62, %v1770_v60  ;;  %2280 = vrcp.f32 %v1476_v1 }
 0x2ed   :  { %v1412_v4 = vmul.f32 %v2271_v2, %v1763_v49 }
 0x2ee   :  { %2282 = vrsqrt.f32 %v2758_v3  ;;  %v1773_v5 = vpop.f32.mrb[26].mxu1  ;;  %v2273_v8 = vpop.eup %2272  ;;  %v1477_v18 = vadd.f32 1.0, %v2758_v3  ;;  %vm1434_vm8 = vcmp.eq.f32.partialorder %v2758_v3, inf  ;;  %vm1436_vm9 = vcmp.eq.f32.partialorder %v2758_v3, 0.0 }
 0x2ef   :  { %v1774_v9 = vpop.f32.mrb[27].mxu1  ;;  %v1414_v17 = vsel %vm1413_vm1, %v1763_v49, %v1412_v4 }
 0x2f0   :  { %v2275_v19 = vpop.eup %2274  ;;  %v2762_v23 = vadd.f32 %v1774_v9, %v1773_v5  ;;  %v1417_v10 = vsel %vm1415_vm2, %v1416_v7, %v1414_v17  ;;  %2284 = vrcp.f32 %v1477_v18 }
 0x2f1   :  { %v1484_v11 = vmul.f32 %v2273_v8, %v1417_v10  ;;  %v1419_v25 = vmul.f32 %v2275_v19, %v1766_v54 }
 0x2f2   :  { %2286 = vrsqrt.f32 %v2762_v23  ;;  %v1776_v27 = vpop.f32.mrb[28].mxu1  ;;  %v2277_v31 = vpop.eup %2276  ;;  %v1478_v33 = vadd.f32 1.0, %v2762_v23  ;;  %vm1441_vm10 = vcmp.eq.f32.partialorder %v2762_v23, inf  ;;  %v1444_v7 = vand.u32 2147483648, %v2762_v23 }
 0x2f3   :  { %v1777_v12 = vpop.f32.mrb[29].mxu1  ;;  %1720 = vmatmul.mubr.msk.f32.vlgmr.msra.gmra.mrb[36].mxu1 %vm1509_vm3, %v1484_v11  ;;  %v1421_v13 = vsel %vm1420_vm4, %v1766_v54, %v1419_v25  ;;  %v1437_v54 = vand.u32 2147483648, %v2758_v3  ;;  %vm1443_vm11 = vcmp.eq.f32.partialorder %v2762_v23, 0.0 }
 0x2f4   :  { %v2279_v34 = vpop.eup %2278  ;;  %v2767_v35 = vadd.f32 %v1777_v12, %v1776_v27  ;;  %1607 = vmatprep.mubr.f32.mxu1 %v2432_v0  ;;  %v1424_v38 = vsel %vm1422_vm5, %v1423_v28, %v1421_v13  ;;  %2288 = vrcp.f32 %v1478_v33 }
 0x2f5   :  { %v1486_v14 = vmul.f32 %v2277_v31, %v1424_v38  ;;  %v1426_v15 = vmul.f32 %v2279_v34, %v1769_v59 }
 0x2f6   :  { %2290 = vrsqrt.f32 %v2767_v35  ;;  %v1779_v21 = vpop.f32.mrb[30].mxu1  ;;  %v2281_v41 = vpop.eup %2280  ;;  %v1479_v44 = vadd.f32 1.0, %v2767_v35  ;;  %vm1448_vm12 = vcmp.eq.f32.partialorder %v2767_v35, inf  ;;  %v1451_v27 = vand.u32 2147483648, %v2767_v35 }
 0x2f7   :  { %v1780_v42 = vpop.f32.mrb[31].mxu1  ;;  %1721 = vmatmul.mubr.msk.f32.gmra.mrb[38].mxu1 %vm1509_vm3, %v1486_v14  ;;  %v1428_v43 = vsel %vm1427_vm6, %v1769_v59, %v1426_v15  ;;  %vm1450_vm13 = vcmp.eq.f32.partialorder %v2767_v35, 0.0 }
 0x2f8   :  { %v2283_v46 = vpop.eup %2282  ;;  %v2773_v48 = vadd.f32 %v1780_v42, %v1779_v21  ;;  %1613 = vmatprep.mubr.f32.mxu1 %v2432_v0  ;;  %v1431_v49 = vsel %vm1429_vm7, %v1430_v22, %v1428_v43  ;;  %2292 = vrcp.f32 %v1479_v44 }
 0x2f9   :  { %v1488_v50 = vmul.f32 %v2281_v41, %v1431_v49  ;;  %v1433_v51 = vmul.f32 %v2283_v46, %v2758_v3 }
 0x2fa   :  { %2294 = vrsqrt.f32 %v2773_v48  ;;  %v1782_v52 = vpop.f32.mrb[32].mxu1  ;;  %v2285_v56 = vpop.eup %2284  ;;  %v1480_v59 = vadd.f32 1.0, %v2773_v48  ;;  %vm1455_vm14 = vcmp.eq.f32.partialorder %v2773_v48, inf  ;;  %v1458_v38 = vand.u32 2147483648, %v2773_v48 }
 0x2fb   :  { %v1783_v57 = vpop.f32.mrb[33].mxu1  ;;  %1722 = vmatmul.mubr.msk.f32.gmra.mrb[40].mxu1 %vm1509_vm3, %v1488_v50  ;;  %v1435_v58 = vsel %vm1434_vm8, %v2758_v3, %v1433_v51  ;;  %vm1457_vm15 = vcmp.eq.f32.partialorder %v2773_v48, 0.0 }
 0x2fc   :  { %v2287_v60 = vpop.eup %2286  ;;  %v1784_v62 = vadd.f32 %v1783_v57, %v1782_v52  ;;  %1619 = vmatprep.mubr.f32.mxu1 %v2432_v0  ;;  %v1438_v1 = vsel %vm1436_vm9, %v1437_v54, %v1435_v58  ;;  %2296 = vrcp.f32 %v1480_v59 }
 0x2fd   :  { %v1490_v2 = vmul.f32 %v2285_v56, %v1438_v1  ;;  %v1440_v4 = vmul.f32 %v2287_v60, %v2762_v23 }
 0x2fe   :  { %2298 = vrsqrt.f32 %v1784_v62  ;;  %v1785_v5 = vpop.f32.mrb[34].mxu1  ;;  %v2289_v8 = vpop.eup %2288  ;;  %v1481_v17 = vadd.f32 1.0, %v1784_v62  ;;  %vm1462_vm0 = vcmp.eq.f32.partialorder %v1784_v62, inf  ;;  %v1465_v42 = vand.u32 2147483648, %v1784_v62 }
 0x2ff   :  { %v1786_v9 = vpop.f32.mrb[35].mxu1  ;;  %1723 = vmatmul.mubr.msk.f32.gmra.mrb[42].mxu1 %vm1509_vm3, %v1490_v2  ;;  %v1442_v3 = vsel %vm1441_vm10, %v2762_v23, %v1440_v4  ;;  %vm1464_vm1 = vcmp.eq.f32.partialorder %v1784_v62, 0.0 }
 0x300   :  { %v2291_v18 = vpop.eup %2290  ;;  %v1787_v19 = vadd.f32 %v1786_v9, %v1785_v5  ;;  %1625 = vmatprep.mubr.f32.mxu1 %v2432_v0  ;;  %v1445_v10 = vsel %vm1443_vm11, %v1444_v7, %v1442_v3  ;;  %2300 = vrcp.f32 %v1481_v17 }
 0x301   :  { %v1492_v11 = vmul.f32 %v2289_v8, %v1445_v10  ;;  %v1447_v25 = vmul.f32 %v2291_v18, %v2767_v35 }
 0x302   :  { %2302 = vrsqrt.f32 %v1787_v19  ;;  %v2293_v28 = vpop.eup %2292  ;;  %v1482_v31 = vadd.f32 1.0, %v1787_v19  ;;  %vm1469_vm2 = vcmp.eq.f32.partialorder %v1787_v19, inf  ;;  %vm1471_vm4 = vcmp.eq.f32.partialorder %v1787_v19, 0.0 }
 0x303   :  { %1724 = vmatmul.mubr.msk.f32.gmra.mrb[44].mxu1 %vm1509_vm3, %v1492_v11  ;;  %v1449_v23 = vsel %vm1448_vm12, %v2767_v35, %v1447_v25 }
 0x304   :  { %v2295_v12 = vpop.eup %2294  ;;  %1631 = vmatprep.mubr.f32.mxu1 %v2432_v0  ;;  %v1452_v13 = vsel %vm1450_vm13, %v1451_v27, %v1449_v23  ;;  %2304 = vrcp.f32 %v1482_v31 }
 0x305   :  { %v1494_v33 = vmul.f32 %v2293_v28, %v1452_v13  ;;  %v1454_v34 = vmul.f32 %v2295_v12, %v2773_v48 }
 0x306   :  { %v2297_v14 = vpop.eup %2296 }
 0x307   :  { %1725 = vmatmul.mubr.msk.f32.gmra.mrb[46].mxu1 %vm1509_vm3, %v1494_v33  ;;  %v1456_v15 = vsel %vm1455_vm14, %v2773_v48, %v1454_v34  ;;  %v1472_v48 = vand.u32 2147483648, %v1787_v19 }
 0x308   :  { %v2299_v35 = vpop.eup %2298  ;;  %1637 = vmatprep.mubr.f32.mxu1 %v2432_v0  ;;  %v1459_v21 = vsel %vm1457_vm15, %v1458_v38, %v1456_v15 }
 0x309   :  { %v1496_v22 = vmul.f32 %v2297_v14, %v1459_v21  ;;  %v1461_v41 = vmul.f32 %v2299_v35, %v1784_v62 }
 0x30a   :  { %v2301_v43 = vpop.eup %2300 }
 0x30b   :  { %1726 = vmatmul.mubr.msk.f32.gmra.mrb[48].mxu1 %vm1509_vm3, %v1496_v22  ;;  %v1463_v44 = vsel %vm1462_vm0, %v1784_v62, %v1461_v41 }
 0x30c   :  { %v2303_v46 = vpop.eup %2302  ;;  %1643 = vmatprep.mubr.f32.mxu1 %v2432_v0  ;;  %v1466_v49 = vsel %vm1464_vm1, %v1465_v42, %v1463_v44 }
 0x30d   :  { %v1498_v50 = vmul.f32 %v2301_v43, %v1466_v49  ;;  %v1468_v51 = vmul.f32 %v2303_v46, %v1787_v19 }
 0x30e   :  { %v2305_v54 = vpop.eup %2304 }
 0x30f   :  { %1727 = vmatmul.mubr.msk.f32.gmra.mrb[50].mxu1 %vm1509_vm3, %v1498_v50  ;;  %v1470_v52 = vsel %vm1469_vm2, %v1787_v19, %v1468_v51 }
 0x310   :  { %1649 = vmatprep.mubr.f32.mxu1 %v2432_v0  ;;  %v1473_v56 = vsel %vm1471_vm4, %v1472_v48, %v1470_v52 }
 0x311   :  { %v1500_v57 = vmul.f32 %v2305_v54, %v1473_v56 }
 0x313   :  { %1728 = vmatmul.mubr.msk.f32.gmra.mrb[52].mxu1 %vm1509_vm3, %v1500_v57 }
 0x3c6   :  { %v1603_v58 = vpop.f32.mrb[36].mxu1 }
 0x3c7   :  { %v1656_v59 = vmul.f32 %v2661_v26, %v1603_v58  ;;  %v1605_v60 = vpop.f32.mrb[37].mxu1 }
 0x3c8   :  { %v1657_v62 = vmul.f32 %v2663_v30, %v1605_v60 }
 0x3c9   :  { %1674 = vst [vmem:[#allocation10] sm:$0xff] %v1656_v59 }
 0x3ca   :  { %1675 = vst [vmem:[#allocation10 + $0x8] sm:$0xff] %v1657_v62  ;;  %v1609_v1 = vpop.f32.mrb[38].mxu1 }
 0x3cb   :  { %v1658_v2 = vmul.f32 %v2671_v37, %v1609_v1  ;;  %v1611_v4 = vpop.f32.mrb[39].mxu1 }
 0x3cc   :  { %v1659_v5 = vmul.f32 %v2673_v39, %v1611_v4 }
 0x3cd   :  { %1676 = vst [vmem:[#allocation10 + $0x10] sm:$0xff] %v1658_v2 }
 0x3ce   :  { %1677 = vst [vmem:[#allocation10 + $0x18] sm:$0xff] %v1659_v5  ;;  %v1615_v0 = vpop.f32.mrb[40].mxu1 }
 0x3cf   :  { %v1660_v7 = vmul.f32 %v2681_v45, %v1615_v0  ;;  %v1617_v8 = vpop.f32.mrb[41].mxu1 }
 0x3d0   :  { %v1661_v9 = vmul.f32 %v2683_v47, %v1617_v8 }
 0x3d1   :  { %1678 = vst [vmem:[#allocation10 + $0x20] sm:$0xff] %v1660_v7 }
 0x3d2   :  { %1679 = vst [vmem:[#allocation10 + $0x28] sm:$0xff] %v1661_v9  ;;  %v1621_v26 = vpop.f32.mrb[42].mxu1 }
 0x3d3   :  { %v1662_v30 = vmul.f32 %v2691_v53, %v1621_v26  ;;  %v1623_v3 = vpop.f32.mrb[43].mxu1 }
 0x3d4   :  { %v1663_v17 = vmul.f32 %v2693_v55, %v1623_v3 }
 0x3d5   :  { %1680 = vst [vmem:[#allocation10 + $0x30] sm:$0xff] %v1662_v30 }
 0x3d6   :  { %1681 = vst [vmem:[#allocation10 + $0x38] sm:$0xff] %v1663_v17  ;;  %v1627_v37 = vpop.f32.mrb[44].mxu1 }
 0x3d7   :  { %v1664_v39 = vmul.f32 %v2701_v61, %v1627_v37  ;;  %v1629_v18 = vpop.f32.mrb[45].mxu1 }
 0x3d8   :  { %v1665_v19 = vmul.f32 %v2703_v63, %v1629_v18 }
 0x3d9   :  { %1682 = vst [vmem:[#allocation10 + $0x40] sm:$0xff] %v1664_v39 }
 0x3da   :  { %1683 = vst [vmem:[#allocation10 + $0x48] sm:$0xff] %v1665_v19  ;;  %v1633_v45 = vpop.f32.mrb[46].mxu1 }
 0x3db   :  { %v1666_v47 = vmul.f32 %v2713_v6, %v1633_v45  ;;  %v1635_v10 = vpop.f32.mrb[47].mxu1 }
 0x3dc   :  { %v1667_v11 = vmul.f32 %v2715_v16, %v1635_v10 }
 0x3dd   :  { %1684 = vst [vmem:[#allocation10 + $0x50] sm:$0xff] %v1666_v47 }
 0x3de   :  { %1685 = vst [vmem:[#allocation10 + $0x58] sm:$0xff] %v1667_v11  ;;  %v1639_v53 = vpop.f32.mrb[48].mxu1 }
 0x3df   :  { %v1668_v55 = vmul.f32 %v2725_v20, %v1639_v53  ;;  %v1641_v25 = vpop.f32.mrb[49].mxu1 }
 0x3e0   :  { %v1669_v27 = vmul.f32 %v2727_v24, %v1641_v25 }
 0x3e1   :  { %1686 = vst [vmem:[#allocation10 + $0x60] sm:$0xff] %v1668_v55 }
 0x3e2   :  { %1687 = vst [vmem:[#allocation10 + $0x68] sm:$0xff] %v1669_v27  ;;  %v1645_v61 = vpop.f32.mrb[50].mxu1 }
 0x3e3   :  { %v1670_v63 = vmul.f32 %v2737_v29, %v1645_v61  ;;  %v1647_v28 = vpop.f32.mrb[51].mxu1 }
 0x3e4   :  { %v1671_v23 = vmul.f32 %v2739_v32, %v1647_v28 }
 0x3e5   :  { %1688 = vst [vmem:[#allocation10 + $0x70] sm:$0xff] %v1670_v63 }
 0x3e6   :  { %1689 = vst [vmem:[#allocation10 + $0x78] sm:$0xff] %v1671_v23  ;;  %v1651_v6 = vpop.f32.mrb[52].mxu1 }
 0x3e7   :  { %v1672_v16 = vmul.f32 %v2749_v36, %v1651_v6  ;;  %v1653_v31 = vpop.f32.mrb[53].mxu1 }
 0x3e8   :  { %v1673_v20 = vmul.f32 %v2751_v40, %v1653_v31 }
 0x3e9   :  { %1690 = vst [vmem:[#allocation10 + $0x80] sm:$0xff] %v1672_v16 }
 0x3ea   :  { %1691 = vst [vmem:[#allocation10 + $0x88] sm:$0xff] %v1673_v20 }
 0x3eb   :  { %2405 = shalt.err (!%p2402_p8)
}
 0x3ec   :  { %s2406_s0 = scalar_lea.hbm %s2849_s5, 2304 }
 0x3ed   :  { %p2407_p9 = scmp.ne.s32.totalorder %s2849_s5, %s2406_s0  ;;  %p2410_p10 = scmp.lt.u32.totalorder %s2406_s0, %s2849_s5 }
 0x3ef   :  { %p2412_p11 = pnand %p2410_p10, %p2407_p9 }
 0x3f1   :  { %2415 = shalt.err (!%p2412_p11)
}
 0x3f2   :  { %1703 = dma.vmem_to_hbm [thread:$0]  %s1698_s27, 2304, %s2849_s5, [#allocation4], %s2425_s28, %s2425_s28, %s2426_s29  }
 0x3f3   :  { %2422 = dma.done.wait [#allocation4], 2304  }
 0x3f4   :  { %2423 = vsyncadd [#allocation4], 4294964992 }
 0x3f5   :  { %1707 = vsyncpa [#allocation3], 1 }
 0x3f6   :  { %1708 = vsyncpa [#allocation6], 1 }
 0x3f7   :  { %1709 = vsyncpa [#allocation9], 1 }
 0x3f8   :  { %1710 = vsyncpa [#allocation4], 1 }

</bundles_post_ra>
